<compile_context>
chip_gen: v7x
topology: tpu7x:2x2x1
jax: 0.10.0
libtpu: 0.0.40
codegen_flags: <defaults>
</compile_context>

<pallas_src>
import functools
import inspect

import jax
import jax.numpy as jnp
import numpy as np
from jax import lax
from jax.experimental import pallas as pl
from jax.experimental.pallas import tpu as pltpu


# ---- torchvision vgg19().features[:29] layer sequence -----------------------
def _vgg19_layers():
    layers = []
    conv = lambda cin, cout: layers.append(("conv", cin, cout))
    relu = lambda: layers.append(("relu", None, None))
    pool = lambda: layers.append(("pool", None, None))
    conv(3, 64); relu(); conv(64, 64); relu(); pool()
    conv(64, 128); relu(); conv(128, 128); relu(); pool()
    conv(128, 256); relu(); conv(256, 256); relu()
    conv(256, 256); relu(); conv(256, 256); relu(); pool()
    conv(256, 512); relu(); conv(512, 512); relu()
    conv(512, 512); relu(); conv(512, 512); relu(); pool()
    conv(512, 512)                       # layer 28 (captured pre-ReLU)
    return tuple(layers)


_LAYERS = _vgg19_layers()
_CHOSEN = (0, 5, 10, 19, 28)             # self.chosen_features


def _pick_vmem_limit():
    # Generation-aware VMEM budget: ~62% of physical VMEM (v5e/v6e 128 MiB ->
    # 80 MiB, v7x 64 MiB -> 40 MiB); falls back via device_kind, conservative
    # if the generation cannot be determined at all.
    cap = None
    try:
        cap = int(pltpu.get_tpu_info().vmem_capacity_bytes)
    except Exception:
        cap = None
    if cap is None:
        kind = ""
        try:
            kind = jax.devices()[0].device_kind.lower()
        except Exception:
            pass
        if ("v7" in kind) or ("7x" in kind):
            cap = 64 * 1024 * 1024
        elif ("v5" in kind) or ("v6" in kind):
            cap = 128 * 1024 * 1024
        else:
            cap = 64 * 1024 * 1024       # unknown generation: stay conservative
    return max(32 * 1024 * 1024, min(cap * 5 // 8, 100 * 1024 * 1024))


_VMEM_LIMIT = _pick_vmem_limit()


def _supports_pipeline_mode():
    if not hasattr(pl, "Buffered"):
        return False
    try:
        return "pipeline_mode" in inspect.signature(pl.BlockSpec).parameters
    except (TypeError, ValueError):
        return False


_SINGLE_BUFFER_CONSTS = None  # resolved lazily (and demoted on failure)


def _pick_tile_rows(H, W, Cin, Cout, capture, emit_post, do_pool):
    """Largest legal row tile TH (divides H, even when pooling, bf16-tileable
    output blocks) whose per-step working set fits the VMEM budget; prefers
    >= 2 row tiles so the row axis shards across TensorCores even at batch=1."""
    def legal(th):
        if H % th:
            return False
        if do_pool and th % 2:
            return False
        if th == H:
            return True                   # block == full dim: always legal
        if (th * W) % 16:                 # bf16 (16,128) tiling of out blocks
            return False
        if do_pool and ((th // 2) * (W // 2)) % 16:
            return False
        return True

    def vmem_bytes(th):
        thw = th * W
        slab = (th + 2) * W * 3 * Cin * 2               # bf16 halo slab scratch
        acc = thw * Cout * 4                            # f32 accumulator values
        outs = thw * Cout * 2 * (int(capture) + int(emit_post))
        outs += (thw // 4) * Cout * 2 * int(do_pool)
        x_in = H * W * Cin * 2                          # resident image block
        wts = 9 * Cin * Cout * 2 + Cout * 4
        return slab + acc + 2 * (outs + x_in) + wts

    budget = (_VMEM_LIMIT * 3) // 5
    cands = [th for th in range(H, 0, -1) if legal(th)]
    if not cands:
        return H
    for th in cands:                                    # prefer >= 2 row tiles
        if th <= max(H // 2, 1) and vmem_bytes(th) <= budget:
            return th
    for th in cands:
        if vmem_bytes(th) <= budget:
            return th
    return cands[-1]


# ------------------------------ fused conv3x3 (+bias, +ReLU, +2x2 maxpool) --
def _conv_kernel(x_ref, w_ref, b_ref, *refs, H, W, TH, Cin, Cout,
                 capture, emit_post, do_pool):
    """One (batch, row-tile) grid step.

    x_ref : (H*W, Cin)       bf16, whole image (resident across the row axis)
    w_ref : (3, 3*Cin, Cout) bf16, dh-major weights, dw taps packed along K
    b_ref : (1, Cout)        f32
    outputs (in order, per-tile blocks): pre-ReLU bf16 (if capture),
      post-ReLU bf16 (if emit_post), 2x2-pooled post-ReLU bf16 (if do_pool)
    slab_ref : ((TH+2)*W, 3*Cin) bf16 scratch [x(w-1) | x(w) | x(w+1)].
    """
    *out_refs, slab_ref = refs
    k = 0
    pre_ref = post_ref = pool_ref = None
    if capture:
        pre_ref = out_refs[k]; k += 1
    if emit_post:
        post_ref = out_refs[k]; k += 1
    if do_pool:
        pool_ref = out_refs[k]; k += 1

    t = pl.program_id(1)
    THW = TH * W
    L = (TH + 2) * W
    r0 = t * TH                                  # first output row of this tile

    # ---- gather the (TH+2)-row window; halo rows zeroed at the image edges.
    core_start = r0 * W
    if THW % 8 == 0:
        core_start = pl.multiple_of(core_start, 8)
    top_start = jnp.maximum(r0 - 1, 0) * W
    bot_start = jnp.minimum(r0 + TH, H - 1) * W
    core = x_ref[pl.ds(core_start, THW), :]
    top = x_ref[pl.ds(top_start, W), :]
    bot = x_ref[pl.ds(bot_start, W), :]
    top = jnp.where(t > 0, top, jnp.zeros_like(top))          # halo row above
    bot = jnp.where(r0 + TH < H, bot, jnp.zeros_like(bot))    # halo row below
    xt = jnp.concatenate([top, core, bot], axis=0)            # (L, Cin)

    # ---- three column-shifted copies packed along K; only wrap cols zeroed.
    col = lax.broadcasted_iota(jnp.int32, (L, 1), 0) % W
    zrow = jnp.zeros((1, Cin), dtype=xt.dtype)
    xm1 = jnp.concatenate([zrow, xt[:-1]], axis=0)            # x[.., w-1]
    xp1 = jnp.concatenate([xt[1:], zrow], axis=0)             # x[.., w+1]
    left = jnp.where(col != 0, xm1, jnp.zeros_like(xm1))
    right = jnp.where(col != W - 1, xp1, jnp.zeros_like(xp1))
    slab_ref[...] = jnp.concatenate([left, xt, right], axis=1)  # (L, 3*Cin)

    # ---- MXU matmuls, f32 accumulation held in values (no RMW scratch).
    if Cin <= 8:
        # conv0 (Cin=3): full im2col -> a single matmul with K = 9*Cin (= 27).
        lhs = jnp.concatenate(
            [slab_ref[pl.ds(dh * W, THW), :] for dh in range(3)], axis=1)
        acc = jnp.dot(lhs, w_ref[...].reshape(9 * Cin, Cout),
                      preferred_element_type=jnp.float32)
    else:
        acc = jnp.dot(slab_ref[pl.ds(0, THW), :], w_ref[0],
                      preferred_element_type=jnp.float32)
        acc = acc + jnp.dot(slab_ref[pl.ds(W, THW), :], w_ref[1],
                            preferred_element_type=jnp.float32)
        acc = acc + jnp.dot(slab_ref[pl.ds(2 * W, THW), :], w_ref[2],
                            preferred_element_type=jnp.float32)

    # ---- epilogue: bias, captured pre-ReLU, fused ReLU, fused 2x2 maxpool.
    pre = acc + b_ref[...]                                    # (THW, Cout) f32
    if capture:
        pre_ref[...] = pre.astype(pre_ref.dtype)
    if emit_post or do_pool:
        post = jnp.maximum(pre, 0.0)
    if emit_post:
        post_ref[...] = post.astype(post_ref.dtype)
    if do_pool:
        p = post.reshape(TH, W // 2, 2, Cout)
        wm = jnp.maximum(p[:, :, 0, :], p[:, :, 1, :])        # (TH, W/2, Cout)
        q = wm.reshape(TH // 2, 2, W // 2, Cout)
        hm = jnp.maximum(q[:, 0, :, :], q[:, 1, :, :])        # (TH/2, W/2, Cout)
        pool_ref[...] = hm.reshape((TH // 2) * (W // 2),
                                   Cout).astype(pool_ref.dtype)


def conv3x3(x, w, b, *, H, W, capture, emit_post, do_pool):
    """Fused 3x3/s1/p1 conv (+bias, +ReLU, +optional 2x2 maxpool) on flattened
    channels-last activations (N, H*W, Cin)."""
    global _SINGLE_BUFFER_CONSTS
    if _SINGLE_BUFFER_CONSTS is None:
        _SINGLE_BUFFER_CONSTS = _supports_pipeline_mode()

    N, HW, Cin = x.shape
    assert HW == H * W
    Cout = w.shape[-1]
    TH = _pick_tile_rows(H, W, Cin, Cout, capture, emit_post, do_pool)
    T = H // TH
    THW = TH * W

    x = x.astype(jnp.bfloat16)
    wk = w.astype(jnp.bfloat16).reshape(3, 3 * Cin, Cout)   # dw packed along K
    bb = b.astype(jnp.float32).reshape(1, Cout)

    out_shape, out_specs = [], []
    if capture:          # pre-ReLU conv output (captured feature), bf16
        out_shape.append(jax.ShapeDtypeStruct((N, HW, Cout), jnp.bfloat16))
        out_specs.append(pl.BlockSpec((None, THW, Cout), lambda n, t: (n, t, 0)))
    if emit_post:        # fused-ReLU output feeding the next conv, bf16
        out_shape.append(jax.ShapeDtypeStruct((N, HW, Cout), jnp.bfloat16))
        out_specs.append(pl.BlockSpec((None, THW, Cout), lambda n, t: (n, t, 0)))
    if do_pool:          # fused ReLU + 2x2/2 maxpool output, bf16
        Ho, Wo = H // 2, W // 2
        out_shape.append(jax.ShapeDtypeStruct((N, Ho * Wo, Cout), jnp.bfloat16))
        out_specs.append(
            pl.BlockSpec((None, (TH // 2) * Wo, Cout), lambda n, t: (n, t, 0)))

    kern = functools.partial(_conv_kernel, H=H, W=W, TH=TH, Cin=Cin, Cout=Cout,
                             capture=capture, emit_post=emit_post,
                             do_pool=do_pool)

    def _call(single_buffer_consts):
        const_kw = {}
        if single_buffer_consts:
            const_kw = dict(pipeline_mode=pl.Buffered(1))
        in_specs = [
            # whole image, resident across the row-tile axis (index const in t)
            pl.BlockSpec((None, HW, Cin), lambda n, t: (n, 0, 0)),
            pl.BlockSpec((3, 3 * Cin, Cout), lambda n, t: (0, 0, 0), **const_kw),
            pl.BlockSpec((1, Cout), lambda n, t: (0, 0), **const_kw),
        ]
        return pl.pallas_call(
            kern,
            out_shape=tuple(out_shape),
            grid=(N, T),
            in_specs=in_specs,
            out_specs=tuple(out_specs),
            scratch_shapes=[pltpu.VMEM(((TH + 2) * W, 3 * Cin), jnp.bfloat16)],
            compiler_params=pltpu.CompilerParams(
                dimension_semantics=("parallel", "parallel"),
                vmem_limit_bytes=_VMEM_LIMIT),
        )(x, wk, bb)

    if _SINGLE_BUFFER_CONSTS:
        try:
            outs = _call(True)
        except Exception:   # pipeline_mode / Buffered(1) unsupported -> retry
            _SINGLE_BUFFER_CONSTS = False
            outs = _call(False)
    else:
        outs = _call(False)
    if not isinstance(outs, (tuple, list)):
        outs = (outs,)
    return tuple(outs)


# -------------------------------------------------------- forward / params --
def init_params(key):
    params = []
    for kind, cin, cout in _LAYERS:
        if kind != "conv":
            continue
        key, kw, kb = jax.random.split(key, 3)
        std = (2.0 / (9.0 * cin)) ** 0.5
        w = (std * jax.random.normal(kw, (3, 3, cin, cout))).astype(jnp.bfloat16)
        b = (0.01 * jax.random.normal(kb, (cout,))).astype(jnp.float32)
        params.append((w, b))
    return params


def vgg_forward(x_nchw, params):
    """Pallas forward of vgg19.features[:29]; returns the 5 chosen feature maps
    (pre-ReLU conv outputs at layers 0/5/10/19/28) in NCHW like PyTorch."""
    N, C, H, W = x_nchw.shape
    h = jnp.transpose(x_nchw, (0, 2, 3, 1)).astype(jnp.bfloat16)   # NCHW->NHWC
    h = h.reshape(N, H * W, C)                                     # flat spatial
    feats, pi, idx, n_layers = [], 0, 0, len(_LAYERS)
    while idx < n_layers:
        kind, _, cout = _LAYERS[idx]
        assert kind == "conv"          # relu/pool are fused into the conv call
        wt, bb = params[pi]; pi += 1
        capture = idx in _CHOSEN
        has_relu = idx + 1 < n_layers and _LAYERS[idx + 1][0] == "relu"
        has_pool = (has_relu and idx + 2 < n_layers
                    and _LAYERS[idx + 2][0] == "pool")
        outs = conv3x3(h, wt, bb, H=H, W=W, capture=capture,
                       emit_post=has_relu and not has_pool, do_pool=has_pool)
        k = 0
        if capture:
            pre = outs[k]; k += 1
            feats.append(jnp.transpose(pre.reshape(N, H, W, cout),
                                       (0, 3, 1, 2)).astype(jnp.float32))
        if has_pool:                    # ReLU + 2x2 maxpool fused into the conv
            h = outs[k]
            H //= 2; W //= 2
            idx += 3
        elif has_relu:                  # ReLU fused into the conv
            h = outs[k]
            idx += 2
        else:                           # layer 28: captured, network ends
            idx += 1
        C = cout
    return feats


def ref_forward(x_nchw, params):
    """Pure-JAX reference (XLA conv / reduce_window) with the same dtype policy
    (bf16 matmul inputs, fp32 accumulation) for the correctness check."""
    h = jnp.transpose(x_nchw, (0, 2, 3, 1)).astype(jnp.float32)
    feats, pi = [], 0
    for idx, (kind, _, _) in enumerate(_LAYERS):
        if kind == "conv":
            wt, bb = params[pi]; pi += 1
            h = lax.conv_general_dilated(
                h.astype(jnp.bfloat16), wt.astype(jnp.bfloat16),
                window_strides=(1, 1), padding="SAME",
                dimension_numbers=("NHWC", "HWIO", "NHWC"),
                preferred_element_type=jnp.float32) + bb
        elif kind == "relu":
            h = jnp.maximum(h, 0.0)
        else:
            h = lax.reduce_window(h, -jnp.inf, lax.max,
                                  (1, 2, 2, 1), (1, 2, 2, 1), "VALID")
        if idx in _CHOSEN:
            feats.append(jnp.transpose(h, (0, 3, 1, 2)))
    return feats


if __name__ == "__main__":
    key = jax.random.PRNGKey(0)
    kx, kp = jax.random.split(key)
    # Small but VGG-consistent input: NCHW with 3 channels (conv0 expects 3).
    x = jax.random.normal(kx, (2, 3, 16, 16), dtype=jnp.float32)
    params = init_params(kp)

    feats = vgg_forward(x, params)
    feats = jax.block_until_ready(feats)

    expected_shapes = [(2, 64, 16, 16), (2, 128, 8, 8), (2, 256, 4, 4),
                       (2, 512, 2, 2), (2, 512, 1, 1)]
    assert [tuple(f.shape) for f in feats] == expected_shapes, \
        [tuple(f.shape) for f in feats]

    refs = ref_forward(x, params)
    for got, want in zip(feats, refs):
        np.testing.assert_allclose(np.asarray(got, dtype=np.float32),
                                   np.asarray(want, dtype=np.float32),
                                   rtol=2e-2, atol=2e-2)

    print("KERNEL_OK")
</pallas_src>

<mosaic_0001>
module attributes {stable_mosaic.version = 11 : i64} {
  func.func @_conv_kernel(%arg0: i32, %arg1: i32, %arg2: memref<1x256x3xbf16, #tpu.memory_space<vmem>>, %arg3: memref<3x9x64xbf16, #tpu.memory_space<vmem>>, %arg4: memref<1x64xf32, #tpu.memory_space<vmem>>, %arg5: memref<1x128x64xbf16, #tpu.memory_space<vmem>>, %arg6: memref<1x128x64xbf16, #tpu.memory_space<vmem>>, %arg7: memref<160x9xbf16, #tpu.memory_space<vmem>>) attributes {dimension_semantics = [#tpu.dimension_semantics<parallel>, #tpu.dimension_semantics<parallel>], iteration_bounds = array<i64: 2, 2>, scalar_prefetch = 0 : i64, scratch_operands = 1 : i64, tpu.core_type = #tpu.core_type<tc>, window_params = [{transform_indices = @transform_0, window_bounds = array<i64: 1, 256, 3>}, {pipeline_mode = #tpu.pipeline_mode<synchronous>, transform_indices = @transform_1, window_bounds = array<i64: 3, 9, 64>}, {pipeline_mode = #tpu.pipeline_mode<synchronous>, transform_indices = @transform_2, window_bounds = array<i64: 1, 64>}, {transform_indices = @transform_3, window_bounds = array<i64: 1, 128, 64>}, {transform_indices = @transform_4, window_bounds = array<i64: 1, 128, 64>}]} {
    %c8_i32 = arith.constant 8 : i32
    %0 = arith.muli %arg1, %c8_i32 : i32
    %c16_i32 = arith.constant 16 : i32
    %1 = arith.muli %0, %c16_i32 : i32
    %2 = tpu.assume_multiple %1, 8 : i32
    %c1_i32 = arith.constant 1 : i32
    %3 = arith.subi %0, %c1_i32 : i32
    %c0_i32 = arith.constant 0 : i32
    %4 = arith.maxsi %3, %c0_i32 : i32
    %c16_i32_0 = arith.constant 16 : i32
    %5 = arith.muli %4, %c16_i32_0 : i32
    %c8_i32_1 = arith.constant 8 : i32
    %6 = arith.addi %0, %c8_i32_1 : i32
    %c15_i32 = arith.constant 15 : i32
    %7 = arith.minsi %6, %c15_i32 : i32
    %c16_i32_2 = arith.constant 16 : i32
    %8 = arith.muli %7, %c16_i32_2 : i32
    %c0 = arith.constant 0 : index
    %9 = arith.index_cast %2 : i32 to index
    %c0_3 = arith.constant 0 : index
    %10 = vector.load %arg2[%c0, %9, %c0_3] : memref<1x256x3xbf16, #tpu.memory_space<vmem>>, vector<1x128x3xbf16>
    %11 = vector.shape_cast %10 : vector<1x128x3xbf16> to vector<128x3xbf16>
    %c0_4 = arith.constant 0 : index
    %12 = arith.index_cast %5 : i32 to index
    %c0_5 = arith.constant 0 : index
    %13 = vector.load %arg2[%c0_4, %12, %c0_5] : memref<1x256x3xbf16, #tpu.memory_space<vmem>>, vector<1x16x3xbf16>
    %14 = vector.shape_cast %13 : vector<1x16x3xbf16> to vector<16x3xbf16>
    %c0_6 = arith.constant 0 : index
    %15 = arith.index_cast %8 : i32 to index
    %c0_7 = arith.constant 0 : index
    %16 = vector.load %arg2[%c0_6, %15, %c0_7] : memref<1x256x3xbf16, #tpu.memory_space<vmem>>, vector<1x16x3xbf16>
    %17 = vector.shape_cast %16 : vector<1x16x3xbf16> to vector<16x3xbf16>
    %c0_i32_8 = arith.constant 0 : i32
    %18 = arith.cmpi sgt, %arg1, %c0_i32_8 : i32
    %cst = arith.constant 0.000000e+00 : bf16
    %19 = vector.broadcast %cst : bf16 to vector<16x3xbf16>
    %20 = arith.select %18, %14, %19 : vector<16x3xbf16>
    %c8_i32_9 = arith.constant 8 : i32
    %21 = arith.addi %0, %c8_i32_9 : i32
    %c16_i32_10 = arith.constant 16 : i32
    %22 = arith.cmpi slt, %21, %c16_i32_10 : i32
    %cst_11 = arith.constant 0.000000e+00 : bf16
    %23 = vector.broadcast %cst_11 : bf16 to vector<16x3xbf16>
    %24 = arith.select %22, %17, %23 : vector<16x3xbf16>
    %25 = tpu.concatenate %20, %11, %24 in 0 : vector<16x3xbf16>, vector<128x3xbf16>, vector<16x3xbf16> -> vector<160x3xbf16>
    %26 = tpu.iota {dimensions = array<i32: 0>} : vector<160x1xi32>
    %c16_i32_12 = arith.constant 16 : i32
    %c0_i32_13 = arith.constant 0 : i32
    %27 = arith.cmpi eq, %c16_i32_12, %c0_i32_13 : i32
    %c1_i32_14 = arith.constant 1 : i32
    %28 = arith.select %27, %c1_i32_14, %c16_i32_12 : i32
    %29 = vector.broadcast %28 : i32 to vector<160x1xi32>
    %30 = arith.remsi %26, %29 : vector<160x1xi32>
    %c0_i32_15 = arith.constant 0 : i32
    %31 = vector.broadcast %c0_i32_15 : i32 to vector<160x1xi32>
    %32 = arith.cmpi ne, %30, %31 : vector<160x1xi32>
    %c0_i32_16 = arith.constant 0 : i32
    %33 = vector.broadcast %c0_i32_16 : i32 to vector<160x1xi32>
    %34 = arith.cmpi slt, %30, %33 : vector<160x1xi32>
    %c0_i32_17 = arith.constant 0 : i32
    %35 = arith.cmpi slt, %28, %c0_i32_17 : i32
    %36 = vector.broadcast %35 : i1 to vector<160x1xi1>
    %37 = vector.broadcast %36 : vector<160x1xi1> to vector<160x1xi1>
    %38 = arith.xori %34, %37 : vector<160x1xi1>
    %39 = arith.andi %38, %32 : vector<160x1xi1>
    %40 = vector.broadcast %28 : i32 to vector<160x1xi32>
    %41 = arith.addi %30, %40 : vector<160x1xi32>
    %42 = arith.select %39, %41, %30 : vector<160x1xi1>, vector<160x1xi32>
    %cst_18 = arith.constant 0.000000e+00 : bf16
    %43 = vector.broadcast %cst_18 : bf16 to vector<1x3xbf16>
    %44 = vector.extract_strided_slice %25 {offsets = [0, 0], sizes = [159, 3], strides = [1, 1]} : vector<160x3xbf16> to vector<159x3xbf16>
    %45 = tpu.concatenate %43, %44 in 0 : vector<1x3xbf16>, vector<159x3xbf16> -> vector<160x3xbf16>
    %46 = vector.extract_strided_slice %25 {offsets = [1, 0], sizes = [159, 3], strides = [1, 1]} : vector<160x3xbf16> to vector<159x3xbf16>
    %47 = tpu.concatenate %46, %43 in 0 : vector<159x3xbf16>, vector<1x3xbf16> -> vector<160x3xbf16>
    %c0_i32_19 = arith.constant 0 : i32
    %48 = vector.broadcast %c0_i32_19 : i32 to vector<160x1xi32>
    %49 = arith.cmpi ne, %42, %48 : vector<160x1xi32>
    %cst_20 = arith.constant 0.000000e+00 : bf16
    %50 = vector.broadcast %cst_20 : bf16 to vector<160x3xbf16>
    %51 = vector.shape_cast %49 : vector<160x1xi1> to vector<160x1xi1>
    %52 = vector.broadcast %51 : vector<160x1xi1> to vector<160x3xi1>
    %53 = arith.select %52, %45, %50 : vector<160x3xi1>, vector<160x3xbf16>
    %c15_i32_21 = arith.constant 15 : i32
    %54 = vector.broadcast %c15_i32_21 : i32 to vector<160x1xi32>
    %55 = arith.cmpi ne, %42, %54 : vector<160x1xi32>
    %cst_22 = arith.constant 0.000000e+00 : bf16
    %56 = vector.broadcast %cst_22 : bf16 to vector<160x3xbf16>
    %57 = vector.shape_cast %55 : vector<160x1xi1> to vector<160x1xi1>
    %58 = vector.broadcast %57 : vector<160x1xi1> to vector<160x3xi1>
    %59 = arith.select %58, %47, %56 : vector<160x3xi1>, vector<160x3xbf16>
    %60 = tpu.concatenate %53, %25, %59 in 1 : vector<160x3xbf16>, vector<160x3xbf16>, vector<160x3xbf16> -> vector<160x9xbf16>
    %c0_23 = arith.constant 0 : index
    %c0_24 = arith.constant 0 : index
    %61 = vector.load %arg7[%c0_23, %c0_24] : memref<160x9xbf16, #tpu.memory_space<vmem>>, vector<160x9xbf16>
    tpu.vector_store %arg7[%c0_23, %c0_24], %60 {strides = array<i32>} : memref<160x9xbf16, #tpu.memory_space<vmem>>, vector<160x9xbf16>,
    %c0_25 = arith.constant 0 : index
    %c0_26 = arith.constant 0 : index
    %62 = vector.load %arg7[%c0_25, %c0_26] : memref<160x9xbf16, #tpu.memory_space<vmem>>, vector<128x9xbf16>
    %c16 = arith.constant 16 : index
    %c0_27 = arith.constant 0 : index
    %63 = vector.load %arg7[%c16, %c0_27] : memref<160x9xbf16, #tpu.memory_space<vmem>>, vector<128x9xbf16>
    %c32 = arith.constant 32 : index
    %c0_28 = arith.constant 0 : index
    %64 = vector.load %arg7[%c32, %c0_28] : memref<160x9xbf16, #tpu.memory_space<vmem>>, vector<128x9xbf16>
    %65 = tpu.concatenate %62, %63, %64 in 1 : vector<128x9xbf16>, vector<128x9xbf16>, vector<128x9xbf16> -> vector<128x27xbf16>
    %c0_29 = arith.constant 0 : index
    %c0_30 = arith.constant 0 : index
    %c0_31 = arith.constant 0 : index
    %66 = vector.load %arg3[%c0_29, %c0_30, %c0_31] : memref<3x9x64xbf16, #tpu.memory_space<vmem>>, vector<3x9x64xbf16>
    %67 = vector.shape_cast %66 : vector<3x9x64xbf16> to vector<27x64xbf16>
    %cst_32 = arith.constant dense<0.000000e+00> : vector<128x64xf32>
    %68 = tpu.matmul %65, %67, %cst_32 {dimension_numbers = #tpu.dot_dimension_numbers<[1], [0], [0], [1], [0, 0, 1, 1], [], []>} : vector<128x27xbf16>, vector<27x64xbf16>, vector<128x64xf32> -> vector<128x64xf32>
    %c0_33 = arith.constant 0 : index
    %c0_34 = arith.constant 0 : index
    %69 = vector.load %arg4[%c0_33, %c0_34] : memref<1x64xf32, #tpu.memory_space<vmem>>, vector<1x64xf32>
    %70 = vector.broadcast %69 : vector<1x64xf32> to vector<128x64xf32>
    %71 = arith.addf %68, %70 : vector<128x64xf32>
    %72 = arith.truncf %71 : vector<128x64xf32> to vector<128x64xbf16>
    %c0_35 = arith.constant 0 : index
    %c0_36 = arith.constant 0 : index
    %c0_37 = arith.constant 0 : index
    %73 = vector.load %arg5[%c0_35, %c0_36, %c0_37] : memref<1x128x64xbf16, #tpu.memory_space<vmem>>, vector<1x128x64xbf16>
    %74 = vector.shape_cast %73 : vector<1x128x64xbf16> to vector<128x64xbf16>
    %75 = vector.shape_cast %72 : vector<128x64xbf16> to vector<1x128x64xbf16>
    tpu.vector_store %arg5[%c0_35, %c0_36, %c0_37], %75 {strides = array<i32>} : memref<1x128x64xbf16, #tpu.memory_space<vmem>>, vector<1x128x64xbf16>,
    %cst_38 = arith.constant 0.000000e+00 : f32
    %76 = vector.broadcast %cst_38 : f32 to vector<128x64xf32>
    %77 = arith.maximumf %71, %76 : vector<128x64xf32>
    %78 = arith.truncf %77 : vector<128x64xf32> to vector<128x64xbf16>
    %c0_39 = arith.constant 0 : index
    %c0_40 = arith.constant 0 : index
    %c0_41 = arith.constant 0 : index
    %79 = vector.load %arg6[%c0_39, %c0_40, %c0_41] : memref<1x128x64xbf16, #tpu.memory_space<vmem>>, vector<1x128x64xbf16>
    %80 = vector.shape_cast %79 : vector<1x128x64xbf16> to vector<128x64xbf16>
    %81 = vector.shape_cast %78 : vector<128x64xbf16> to vector<1x128x64xbf16>
    tpu.vector_store %arg6[%c0_39, %c0_40, %c0_41], %81 {strides = array<i32>} : memref<1x128x64xbf16, #tpu.memory_space<vmem>>, vector<1x128x64xbf16>,
    return
  }
  func.func @transform_0(%arg0: i32, %arg1: i32) -> (i32, i32, i32) {
    %c0_i32 = arith.constant 0 : i32
    %c0_i32_0 = arith.constant 0 : i32
    %c0_i32_1 = arith.constant 0 : i32
    return %arg0, %c0_i32, %c0_i32_0 : i32, i32, i32
  }
  func.func @transform_1(%arg0: i32, %arg1: i32) -> (i32, i32, i32) {
    %c0_i32 = arith.constant 0 : i32
    %c0_i32_0 = arith.constant 0 : i32
    %c0_i32_1 = arith.constant 0 : i32
    %c0_i32_2 = arith.constant 0 : i32
    return %c0_i32, %c0_i32_0, %c0_i32_1 : i32, i32, i32
  }
  func.func @transform_2(%arg0: i32, %arg1: i32) -> (i32, i32) {
    %c0_i32 = arith.constant 0 : i32
    %c0_i32_0 = arith.constant 0 : i32
    %c0_i32_1 = arith.constant 0 : i32
    return %c0_i32, %c0_i32_0 : i32, i32
  }
  func.func @transform_3(%arg0: i32, %arg1: i32) -> (i32, i32, i32) {
    %c0_i32 = arith.constant 0 : i32
    %c0_i32_0 = arith.constant 0 : i32
    return %arg0, %arg1, %c0_i32 : i32, i32, i32
  }
  func.func @transform_4(%arg0: i32, %arg1: i32) -> (i32, i32, i32) {
    %c0_i32 = arith.constant 0 : i32
    %c0_i32_0 = arith.constant 0 : i32
    return %arg0, %arg1, %c0_i32 : i32, i32, i32
  }
}

module attributes {stable_mosaic.version = 11 : i64} {
  func.func @_conv_kernel(%arg0: i32, %arg1: i32, %arg2: memref<1x256x3xbf16, #tpu.memory_space<vmem>>, %arg3: memref<3x9x64xbf16, #tpu.memory_space<vmem>>, %arg4: memref<1x64xf32, #tpu.memory_space<vmem>>, %arg5: memref<1x128x64xbf16, #tpu.memory_space<vmem>>, %arg6: memref<1x128x64xbf16, #tpu.memory_space<vmem>>, %arg7: memref<160x9xbf16, #tpu.memory_space<vmem>>) attributes {dimension_semantics = [#tpu.dimension_semantics<parallel>, #tpu.dimension_semantics<parallel>], iteration_bounds = array<i64: 2, 2>, scalar_prefetch = 0 : i64, scratch_operands = 1 : i64, tpu.core_type = #tpu.core_type<tc>, window_params = [{transform_indices = @transform_0, window_bounds = array<i64: 1, 256, 3>}, {pipeline_mode = #tpu.pipeline_mode<synchronous>, transform_indices = @transform_1, window_bounds = array<i64: 3, 9, 64>}, {pipeline_mode = #tpu.pipeline_mode<synchronous>, transform_indices = @transform_2, window_bounds = array<i64: 1, 64>}, {transform_indices = @transform_3, window_bounds = array<i64: 1, 128, 64>}, {transform_indices = @transform_4, window_bounds = array<i64: 1, 128, 64>}]} {
    %c8_i32 = arith.constant 8 : i32
    %0 = arith.muli %arg1, %c8_i32 : i32
    %c16_i32 = arith.constant 16 : i32
    %1 = arith.muli %0, %c16_i32 : i32
    %2 = tpu.assume_multiple %1, 8 : i32
    %c1_i32 = arith.constant 1 : i32
    %3 = arith.subi %0, %c1_i32 : i32
    %c0_i32 = arith.constant 0 : i32
    %4 = arith.maxsi %3, %c0_i32 : i32
    %c16_i32_0 = arith.constant 16 : i32
    %5 = arith.muli %4, %c16_i32_0 : i32
    %c8_i32_1 = arith.constant 8 : i32
    %6 = arith.addi %0, %c8_i32_1 : i32
    %c15_i32 = arith.constant 15 : i32
    %7 = arith.minsi %6, %c15_i32 : i32
    %c16_i32_2 = arith.constant 16 : i32
    %8 = arith.muli %7, %c16_i32_2 : i32
    %c0 = arith.constant 0 : index
    %9 = arith.index_cast %2 : i32 to index
    %c0_3 = arith.constant 0 : index
    %10 = vector.load %arg2[%c0, %9, %c0_3] : memref<1x256x3xbf16, #tpu.memory_space<vmem>>, vector<1x128x3xbf16>
    %11 = vector.shape_cast %10 : vector<1x128x3xbf16> to vector<128x3xbf16>
    %c0_4 = arith.constant 0 : index
    %12 = arith.index_cast %5 : i32 to index
    %c0_5 = arith.constant 0 : index
    %13 = vector.load %arg2[%c0_4, %12, %c0_5] : memref<1x256x3xbf16, #tpu.memory_space<vmem>>, vector<1x16x3xbf16>
    %14 = vector.shape_cast %13 : vector<1x16x3xbf16> to vector<16x3xbf16>
    %c0_6 = arith.constant 0 : index
    %15 = arith.index_cast %8 : i32 to index
    %c0_7 = arith.constant 0 : index
    %16 = vector.load %arg2[%c0_6, %15, %c0_7] : memref<1x256x3xbf16, #tpu.memory_space<vmem>>, vector<1x16x3xbf16>
    %17 = vector.shape_cast %16 : vector<1x16x3xbf16> to vector<16x3xbf16>
    %c0_i32_8 = arith.constant 0 : i32
    %18 = arith.cmpi sgt, %arg1, %c0_i32_8 : i32
    %cst = arith.constant 0.000000e+00 : bf16
    %19 = vector.broadcast %cst : bf16 to vector<16x3xbf16>
    %20 = arith.select %18, %14, %19 : vector<16x3xbf16>
    %c8_i32_9 = arith.constant 8 : i32
    %21 = arith.addi %0, %c8_i32_9 : i32
    %c16_i32_10 = arith.constant 16 : i32
    %22 = arith.cmpi slt, %21, %c16_i32_10 : i32
    %cst_11 = arith.constant 0.000000e+00 : bf16
    %23 = vector.broadcast %cst_11 : bf16 to vector<16x3xbf16>
    %24 = arith.select %22, %17, %23 : vector<16x3xbf16>
    %25 = tpu.concatenate %20, %11, %24 in 0 : vector<16x3xbf16>, vector<128x3xbf16>, vector<16x3xbf16> -> vector<160x3xbf16>
    %26 = tpu.iota {dimensions = array<i32: 0>} : vector<160x1xi32>
    %c16_i32_12 = arith.constant 16 : i32
    %c0_i32_13 = arith.constant 0 : i32
    %27 = arith.cmpi eq, %c16_i32_12, %c0_i32_13 : i32
    %c1_i32_14 = arith.constant 1 : i32
    %28 = arith.select %27, %c1_i32_14, %c16_i32_12 : i32
    %29 = vector.broadcast %28 : i32 to vector<160x1xi32>
    %30 = arith.remsi %26, %29 : vector<160x1xi32>
    %c0_i32_15 = arith.constant 0 : i32
    %31 = vector.broadcast %c0_i32_15 : i32 to vector<160x1xi32>
    %32 = arith.cmpi ne, %30, %31 : vector<160x1xi32>
    %c0_i32_16 = arith.constant 0 : i32
    %33 = vector.broadcast %c0_i32_16 : i32 to vector<160x1xi32>
    %34 = arith.cmpi slt, %30, %33 : vector<160x1xi32>
    %c0_i32_17 = arith.constant 0 : i32
    %35 = arith.cmpi slt, %28, %c0_i32_17 : i32
    %36 = vector.broadcast %35 : i1 to vector<160x1xi1>
    %37 = vector.broadcast %36 : vector<160x1xi1> to vector<160x1xi1>
    %38 = arith.xori %34, %37 : vector<160x1xi1>
    %39 = arith.andi %38, %32 : vector<160x1xi1>
    %40 = vector.broadcast %28 : i32 to vector<160x1xi32>
    %41 = arith.addi %30, %40 : vector<160x1xi32>
    %42 = arith.select %39, %41, %30 : vector<160x1xi1>, vector<160x1xi32>
    %cst_18 = arith.constant 0.000000e+00 : bf16
    %43 = vector.broadcast %cst_18 : bf16 to vector<1x3xbf16>
    %44 = vector.extract_strided_slice %25 {offsets = [0, 0], sizes = [159, 3], strides = [1, 1]} : vector<160x3xbf16> to vector<159x3xbf16>
    %45 = tpu.concatenate %43, %44 in 0 : vector<1x3xbf16>, vector<159x3xbf16> -> vector<160x3xbf16>
    %46 = vector.extract_strided_slice %25 {offsets = [1, 0], sizes = [159, 3], strides = [1, 1]} : vector<160x3xbf16> to vector<159x3xbf16>
    %47 = tpu.concatenate %46, %43 in 0 : vector<159x3xbf16>, vector<1x3xbf16> -> vector<160x3xbf16>
    %c0_i32_19 = arith.constant 0 : i32
    %48 = vector.broadcast %c0_i32_19 : i32 to vector<160x1xi32>
    %49 = arith.cmpi ne, %42, %48 : vector<160x1xi32>
    %cst_20 = arith.constant 0.000000e+00 : bf16
    %50 = vector.broadcast %cst_20 : bf16 to vector<160x3xbf16>
    %51 = vector.shape_cast %49 : vector<160x1xi1> to vector<160x1xi1>
    %52 = vector.broadcast %51 : vector<160x1xi1> to vector<160x3xi1>
    %53 = arith.select %52, %45, %50 : vector<160x3xi1>, vector<160x3xbf16>
    %c15_i32_21 = arith.constant 15 : i32
    %54 = vector.broadcast %c15_i32_21 : i32 to vector<160x1xi32>
    %55 = arith.cmpi ne, %42, %54 : vector<160x1xi32>
    %cst_22 = arith.constant 0.000000e+00 : bf16
    %56 = vector.broadcast %cst_22 : bf16 to vector<160x3xbf16>
    %57 = vector.shape_cast %55 : vector<160x1xi1> to vector<160x1xi1>
    %58 = vector.broadcast %57 : vector<160x1xi1> to vector<160x3xi1>
    %59 = arith.select %58, %47, %56 : vector<160x3xi1>, vector<160x3xbf16>
    %60 = tpu.concatenate %53, %25, %59 in 1 : vector<160x3xbf16>, vector<160x3xbf16>, vector<160x3xbf16> -> vector<160x9xbf16>
    %c0_23 = arith.constant 0 : index
    %c0_24 = arith.constant 0 : index
    %61 = vector.load %arg7[%c0_23, %c0_24] : memref<160x9xbf16, #tpu.memory_space<vmem>>, vector<160x9xbf16>
    tpu.vector_store %arg7[%c0_23, %c0_24], %60 {strides = array<i32>} : memref<160x9xbf16, #tpu.memory_space<vmem>>, vector<160x9xbf16>,
    %c0_25 = arith.constant 0 : index
    %c0_26 = arith.constant 0 : index
    %62 = vector.load %arg7[%c0_25, %c0_26] : memref<160x9xbf16, #tpu.memory_space<vmem>>, vector<128x9xbf16>
    %c16 = arith.constant 16 : index
    %c0_27 = arith.constant 0 : index
    %63 = vector.load %arg7[%c16, %c0_27] : memref<160x9xbf16, #tpu.memory_space<vmem>>, vector<128x9xbf16>
    %c32 = arith.constant 32 : index
    %c0_28 = arith.constant 0 : index
    %64 = vector.load %arg7[%c32, %c0_28] : memref<160x9xbf16, #tpu.memory_space<vmem>>, vector<128x9xbf16>
    %65 = tpu.concatenate %62, %63, %64 in 1 : vector<128x9xbf16>, vector<128x9xbf16>, vector<128x9xbf16> -> vector<128x27xbf16>
    %c0_29 = arith.constant 0 : index
    %c0_30 = arith.constant 0 : index
    %c0_31 = arith.constant 0 : index
    %66 = vector.load %arg3[%c0_29, %c0_30, %c0_31] : memref<3x9x64xbf16, #tpu.memory_space<vmem>>, vector<3x9x64xbf16>
    %67 = vector.shape_cast %66 : vector<3x9x64xbf16> to vector<27x64xbf16>
    %cst_32 = arith.constant dense<0.000000e+00> : vector<128x64xf32>
    %68 = tpu.matmul %65, %67, %cst_32 {dimension_numbers = #tpu.dot_dimension_numbers<[1], [0], [0], [1], [0, 0, 1, 1], [], []>} : vector<128x27xbf16>, vector<27x64xbf16>, vector<128x64xf32> -> vector<128x64xf32>
    %c0_33 = arith.constant 0 : index
    %c0_34 = arith.constant 0 : index
    %69 = vector.load %arg4[%c0_33, %c0_34] : memref<1x64xf32, #tpu.memory_space<vmem>>, vector<1x64xf32>
    %70 = vector.broadcast %69 : vector<1x64xf32> to vector<128x64xf32>
    %71 = arith.addf %68, %70 : vector<128x64xf32>
    %72 = arith.truncf %71 : vector<128x64xf32> to vector<128x64xbf16>
    %c0_35 = arith.constant 0 : index
    %c0_36 = arith.constant 0 : index
    %c0_37 = arith.constant 0 : index
    %73 = vector.load %arg5[%c0_35, %c0_36, %c0_37] : memref<1x128x64xbf16, #tpu.memory_space<vmem>>, vector<1x128x64xbf16>
    %74 = vector.shape_cast %73 : vector<1x128x64xbf16> to vector<128x64xbf16>
    %75 = vector.shape_cast %72 : vector<128x64xbf16> to vector<1x128x64xbf16>
    tpu.vector_store %arg5[%c0_35, %c0_36, %c0_37], %75 {strides = array<i32>} : memref<1x128x64xbf16, #tpu.memory_space<vmem>>, vector<1x128x64xbf16>,
    %cst_38 = arith.constant 0.000000e+00 : f32
    %76 = vector.broadcast %cst_38 : f32 to vector<128x64xf32>
    %77 = arith.maximumf %71, %76 : vector<128x64xf32>
    %78 = arith.truncf %77 : vector<128x64xf32> to vector<128x64xbf16>
    %c0_39 = arith.constant 0 : index
    %c0_40 = arith.constant 0 : index
    %c0_41 = arith.constant 0 : index
    %79 = vector.load %arg6[%c0_39, %c0_40, %c0_41] : memref<1x128x64xbf16, #tpu.memory_space<vmem>>, vector<1x128x64xbf16>
    %80 = vector.shape_cast %79 : vector<1x128x64xbf16> to vector<128x64xbf16>
    %81 = vector.shape_cast %78 : vector<128x64xbf16> to vector<1x128x64xbf16>
    tpu.vector_store %arg6[%c0_39, %c0_40, %c0_41], %81 {strides = array<i32>} : memref<1x128x64xbf16, #tpu.memory_space<vmem>>, vector<1x128x64xbf16>,
    return
  }
  func.func @transform_0(%arg0: i32, %arg1: i32) -> (i32, i32, i32) {
    %c0_i32 = arith.constant 0 : i32
    %c0_i32_0 = arith.constant 0 : i32
    %c0_i32_1 = arith.constant 0 : i32
    return %arg0, %c0_i32, %c0_i32_0 : i32, i32, i32
  }
  func.func @transform_1(%arg0: i32, %arg1: i32) -> (i32, i32, i32) {
    %c0_i32 = arith.constant 0 : i32
    %c0_i32_0 = arith.constant 0 : i32
    %c0_i32_1 = arith.constant 0 : i32
    %c0_i32_2 = arith.constant 0 : i32
    return %c0_i32, %c0_i32_0, %c0_i32_1 : i32, i32, i32
  }
  func.func @transform_2(%arg0: i32, %arg1: i32) -> (i32, i32) {
    %c0_i32 = arith.constant 0 : i32
    %c0_i32_0 = arith.constant 0 : i32
    %c0_i32_1 = arith.constant 0 : i32
    return %c0_i32, %c0_i32_0 : i32, i32
  }
  func.func @transform_3(%arg0: i32, %arg1: i32) -> (i32, i32, i32) {
    %c0_i32 = arith.constant 0 : i32
    %c0_i32_0 = arith.constant 0 : i32
    return %arg0, %arg1, %c0_i32 : i32, i32, i32
  }
  func.func @transform_4(%arg0: i32, %arg1: i32) -> (i32, i32, i32) {
    %c0_i32 = arith.constant 0 : i32
    %c0_i32_0 = arith.constant 0 : i32
    return %arg0, %arg1, %c0_i32 : i32, i32, i32
  }
}

</mosaic_0001>

<bundles_post_ra>
// kernel: tpu_custom_call.1
= control target key start
LH: loop header
LB: loop body
LE: loop exit
PB: predicated region body
PF: predicated region fallthrough
CT: control target
= control target key end

     0   :  { %s2268_s15 = smov 0   ;;  %s2270_s16 = smov 0   ;;  %s3035_s0 = inlined_call_operand.vmem [shape: bf16[2,256,3], index: 0, kind: input, shape index: {}]   ;;  %s3036_s1 = inlined_call_operand.vmem [shape: bf16[3,9,64], index: 1, kind: input, shape index: {}]   ;;  %s3037_s2 = inlined_call_operand.vmem [shape: f32[1,64], index: 2, kind: input, shape index: {}]   ;;  %s3038_s3 = inlined_call_operand.vmem [shape: bf16[2,256,64], index: 3, kind: output, shape index: {0}]   ;;  %s3039_s4 = inlined_call_operand.vmem [shape: bf16[2,256,64], index: 4, kind: output, shape index: {1}]  }
   0x1   :  { %s2272_s17 = smov 0   ;;  %s2274_s18 = smov 0  }
   0x2   :  { %s2276_s19 = smov 0  }
   0x3 LB: > { %s24_s20 = sadd.s32 1, %s2225_s17  ;;  %s27_s21 = sadd.s32 1, %s2229_s18  ;;  %s2233_s19 = sphi %s2276_s19, %s15_s19   ;;  %s2229_s18 = sphi %s2274_s18, %s3077_s18   ;;  %s2225_s17 = sphi %s2272_s17, %s3076_s17   ;;  %s2221_s16 = sphi %s2270_s16, %s3075_s16   ;;  %s2217_s15 = sphi %s2268_s15, %s3074_s15  }
   0x4   : > { %p25_p0 = scmp.ge.s32.totalorder %s24_s20, 2  ;;  %p1970_p1 = scmp.ge.s32.totalorder %s2233_s19, 1 }
   0x5   : > { %p181_p2 = scmp.lt.s32.totalorder %s2233_s19, 5 }
   0x6   : > { %s3079_s20 = smov (%p25_p0, %s24_s20), 0  ;;  %s3081_s21 = smov (!%p25_p0, %s27_s21), %s2229_s18 }
   0x7   : > { %p182_p3 = pnand %p1970_p1, %p181_p2  ;;  %p29_p4 = scmp.ge.s32.totalorder %s3081_s21, 2 }
   0x8   : > { %p220_p5 = scmp.lt.s32.totalorder (!%p182_p3), %s2221_s16, 1  ;;  %s1980_s22 = sshll.u32 (!%p182_p3), %s2217_s15, 7  ;;  %v352_v0 = vlaneseq (!%p182_p3)  ;;  %vm2235_vm0 = vmmov (!%p182_p3), 1   ;;  %v2236_v2 = vmov (!%p182_p3), 0   ;;  %vm706_vm2 = vsmask.f32 (!%p182_p3), 7424 }
   0x9   : > { %s3083_s21 = smov (%p29_p4, %s3081_s21), 0  ;;  %185 = sbr.rel (%p182_p3) target bundleno = 526 (0x20e), region = 32 }
   0xa   : > { %s258_s23 = sshra.s32 (!%p182_p3), %s1980_s22, 3  ;;  %vm810_vm1 = vmpackc.low (!%p182_p3), %vm2235_vm0, %vm2235_vm0  ;;  %v2303_v1 = vshrl.u32 (!%p182_p3), %v352_v0, 7  ;;  %s1979_s26 = sshll.u32 (!%p182_p3), %s2217_s15, 3 }
   0xb   : > { %s1984_s24 = sshll.u32 (!%p182_p3), %s258_s23, 2  ;;  %v2306_v3 = vsel (!%p182_p3), %vm810_vm1, 65537, %v2236_v2  ;;  %s2334_s30 = sadd.s32 (!%p182_p3), 8, %s1979_s26 }
   0xc   : > { %v364_v4 = vadd.s32 (!%p182_p3), 88, %v2303_v1  ;;  %v356_v5 = vadd.s32 (!%p182_p3), 24, %v2303_v1  ;;  %v2312_v6 = vadd.s32 (!%p182_p3), 104, %v2303_v1  ;;  %v2315_v7 = vadd.s32 (!%p182_p3), 40, %v2303_v1  ;;  %p255_p6 = scmp.lt.s32.totalorder (!%p182_p3), %s2334_s30, 15  ;;  %s2237_s6 = smov (!%p182_p3), 3  }
   0xd   : > { %v2324_v8 = vadd.s32 (!%p182_p3), 120, %v2303_v1  ;;  %v2327_v9 = vadd.s32 (!%p182_p3), 56, %v2303_v1  ;;  %v2330_v10 = vadd.s32 (!%p182_p3), 72, %v2303_v1  ;;  %v2337_v11 = vadd.s32 (!%p182_p3), 152, %v2303_v1  ;;  %p296_p7 = scmp.lt.s32.totalorder (!%p182_p3), %s2334_s30, 16  ;;  %s1981_s10 = sadd.s32 (!%p182_p3), 4294967295, %s1979_s26 }
   0xe   : > { %v454_v12 = vand.u32 (!%p182_p3), 15, %v364_v4  ;;  %v398_v13 = vand.u32 (!%p182_p3), 15, %v356_v5  ;;  %v468_v14 = vand.u32 (!%p182_p3), 15, %v2312_v6  ;;  %v412_v15 = vand.u32 (!%p182_p3), 15, %v2315_v7  ;;  %p251_p8 = scmp.gt.s32.totalorder (!%p182_p3), %s1981_s10, 0  ;;  %s2238_s12 = smov (!%p182_p3), 6  }
   0xf   : > { %v482_v20 = vand.u32 (!%p182_p3), 15, %v2324_v8  ;;  %p290_p9 = scmp.gt.s32.totalorder (!%p182_p3), %s2217_s15, 0 }
  0x10   : > { %s3085_s16 = smov (!%p220_p5, %s2221_s16), 1  ;;  %vm2349_vm3 = vcmp.ne.s32.totalorder %v454_v12, 15  ;;  %vm902_vm5 = vcmp.ne.s32.totalorder %v398_v13, 15  ;;  %vm912_vm8 = vcmp.ne.s32.totalorder %v468_v14, 15  ;;  %vm904_vm10 = vcmp.ne.s32.totalorder %v412_v15, 15  ;;  %s3087_s10 = smov (!%p251_p8, %s1981_s10), 0 }
  0x11   : > { %s2072_s25 = sshll.u32 %s3085_s16, 7  ;;  %vm970_vm4 = vmpackc.low %vm2349_vm3, %vm2349_vm3  ;;  %vm914_vm13 = vcmp.ne.s32.totalorder %v482_v20, 15  ;;  %v426_v12 = vand.u32 15, %v2327_v9  ;;  %vm746_vm3 = vcmask 1047552   ;;  %s1982_s22 = sshll.u32 %s3087_s10, 4 }
  0x12   : > { %s2321_s29 = scalar_lea.vmem %s3035_s0, %s2072_s25  ;;  %v990_v38 = vsel %vm970_vm4, 65537, %v2236_v2  ;;  %vm962_vm7 = vmpackc.low %vm902_vm5, %vm902_vm5  ;;  %s2484_s23 = sshra.s32 %s1982_s22, 3 }
  0x13   : > { %s2340_s5 = scalar_lea.vmem %s2321_s29, %s1984_s24  ;;  %v2012_v40 = vcombine.low %v2306_v3, %v990_v38  ;;  %v982_v52 = vsel %vm962_vm7, 65537, %v2236_v2  ;;  %vm972_vm9 = vmpackc.low %vm912_vm8, %vm912_vm8  ;;  %vm906_vm1 = vcmp.ne.s32.totalorder %v426_v12, 15  ;;  %s1985_s24 = sshll.u32 %s2484_s23, 2 }
  0x14   : > { %v2187_v16 = vld [vmem:[%s2340_s5 + $0x8] sm:$0xff]   ;;  %v2347_v17 = vld [vmem:[%s2340_s5] sm:$0xff]   ;;  %v2370_v26 = vld [vmem:[%s2340_s5 + $0x30] sm:$0xff]   ;;  %s256_s7 = scalar_select %p255_p6, %s2334_s30, 15  ;;  %v2008_v55 = vcombine.low %v2306_v3, %v982_v52  ;;  %v992_v57 = vsel %vm972_vm9, 65537, %v2236_v2 }
  0x15   : > { %1053 = vrot.lane.b32.xlu1 %v2187_v16, %s2237_s6  ;;  %v630_v19 = vshrl.u32 %v2187_v16, 16  ;;  %v633_v21 = vshll.u32 %v2187_v16, 16  ;;  %1051 = vrot.lane.b32.xlu0 %v2347_v17, %s2237_s6  ;;  %v625_v22 = vshll.u32 %v2347_v17, 16  ;;  %v2362_v23 = vld [vmem:[%s2340_s5 + $0x28] sm:$0xff]   ;;  %v2365_v24 = vld [vmem:[%s2340_s5 + $0x20] sm:$0xff]   ;;  %v622_v27 = vshrl.u32 %v2347_v17, 16  ;;  %vm964_vm12 = vmpackc.low %vm904_vm10, %vm904_vm10  ;;  %s281_s25 = scalar_lea.vmem %s2321_s29, %s1985_s24 }
  0x16   : > { %v665_v28 = vshll.u32 %v2362_v23, 16  ;;  %v654_v29 = vshrl.u32 %v2365_v24, 16  ;;  %v657_v30 = vshll.u32 %v2365_v24, 16  ;;  %v662_v31 = vshrl.u32 %v2362_v23, 16  ;;  %v2387_v35 = vld [vmem:[%s2340_s5 + $0x10] sm:$0xff]   ;;  %v2413_v45 = vld [vmem:[%s2340_s5 + $0x38] sm:$0xff]   ;;  %vm974_vm15 = vmpackc.low %vm914_vm13, %vm914_vm13 }
  0x17   : > { %v2367_v25 = vrot.slane %v630_v19, 7  ;;  %v673_v32 = vshll.u32 %v2370_v26, 16  ;;  %v670_v34 = vshrl.u32 %v2370_v26, 16  ;;  %v2406_v41 = vrot.slane %v625_v22, 1  ;;  %s1983_s8 = sshll.u32 %s256_s7, 4  ;;  %v2448_v60 = vld [vmem:[%s2340_s5 + $0x18] sm:$0xff]   ;;  %vm966_vm4 = vmpackc.low %vm906_vm1, %vm906_vm1 }
  0x18   : > { %v2391_v36 = vrot.slane %v657_v30, 1  ;;  %v724_v37 = vrot.slane %v665_v28, 1  ;;  %v2401_v39 = vrot.slane %v662_v31, 7  ;;  %v712_v42 = vrot.slane %v633_v21, 1  ;;  %s284_s9 = sshra.s32 %s1983_s8, 3  ;;  %vm2550_vm1 = vmand %vm746_vm3, %vm706_vm2  ;;  %s1973_s22 = sshll.u32 %s2217_s15, 4 }
  0x19   : > { %1061 = vrot.lane.b32.xlu1 %v2362_v23, %s2237_s6  ;;  %v2381_v33 = vor.u32 %v633_v21, %v2367_v25  ;;  %1059 = vrot.lane.b32.xlu0 %v2365_v24, %s2237_s6  ;;  %v641_v43 = vshll.u32 %v2387_v35, 16  ;;  %vm2420_vm6 = vcmp.ne.s16.totalorder %v2012_v40, 0  ;;  %v711_v47 = vor.u32 %v2406_v41, %v622_v27  ;;  %s1986_s11 = sshll.u32 %s284_s9, 2  ;;  %p228_p10 = scmp.lt.s32.totalorder %s1973_s22, 31 }
  0x1a   : > { %v723_v44 = vor.u32 %v2391_v36, %v654_v29  ;;  %v726_v48 = vor.u32 %v724_v37, %v662_v31  ;;  %v727_v49 = vrot.slane %v673_v32, 1  ;;  %v638_v50 = vshrl.u32 %v2387_v35, 16  ;;  %s2456_s13 = scalar_lea.vmem %s2321_s29, %s1986_s11  ;;  %s1974_s23 = sshll.u32 %s3085_s16, 5 }
  0x1b   : > { %v713_v54 = vsel %vm706_vm2, %v711_v47, %v712_v42  ;;  %v714_v58 = vor.u32 %v712_v42, %v630_v19  ;;  %v715_v59 = vrot.slane %v641_v43, 1  ;;  %vm1030_vm11 = vcmp.ne.s16.totalorder %v2008_v55, 0  ;;  %s297_s14 = scalar_select %p296_p7, 1, 0  ;;  %v288_v9 = vld [vmem:[%s2456_s13] sm:$0xf] }
  0x1c   : > { %v725_v51 = vsel %vm706_vm2, %v723_v44, %v724_v37  ;;  %v728_v56 = vsel %vm706_vm2, %v726_v48, %v727_v49  ;;  %v2013_v61 = vcombine.low %v2306_v3, %v992_v57  ;;  %v681_v62 = vshll.u32 %v2413_v45, 16  ;;  %v289_v38 = vld [vmem:[%s2456_s13 + $0x4] sm:$0xf]  ;;  %s291_s26 = scalar_select %p290_p9, 1, 0 }
  0x1d   : > { %1063 = vrot.lane.b32.xlu1 %v2370_v26, %s2237_s6  ;;  %1055 = vrot.lane.b32.xlu0 %v2387_v35, %s2237_s6  ;;  %v1044_v53 = vsel %vm2420_vm6, %v725_v51, 0  ;;  %v729_v63 = vor.u32 %v727_v49, %v670_v34  ;;  %v1040_v0 = vsel %vm1030_vm11, %v713_v54, 0  ;;  %v716_v4 = vsel %vm706_vm2, %v714_v58, %v715_v59  ;;  %s2241_s13 = smov 9   ;;  %s3089_s22 = smov (!%p228_p10, %s1973_s22), 31 }
  0x1e   : > { %v984_v5 = vsel %vm964_vm12, 65537, %v2236_v2  ;;  %vm1035_vm14 = vcmp.ne.s16.totalorder %v2013_v61, 0  ;;  %v2466_v7 = vrot.slane %v681_v62, 1  ;;  %v994_v14 = vsel %vm974_vm15, 65537, %v2236_v2  ;;  %s231_s24 = sadd.s32 %s1974_s23, %s3089_s22 }
  0x1f   : > { %v2009_v6 = vcombine.low %v2306_v3, %v984_v5  ;;  %v1045_v13 = vsel %vm1035_vm14, %v728_v56, 0  ;;  %v649_v8 = vshll.u32 %v2448_v60, 16  ;;  %v717_v15 = vor.u32 %v715_v59, %v638_v50  ;;  %s1975_s27 = sshll.u32 %s231_s24, 2 }
  0x20   : > { %v731_v16 = vsel %vm706_vm2, %v729_v63, %v2466_v7  ;;  %v2014_v18 = vcombine.low %v2306_v3, %v994_v14  ;;  %v440_v21 = vand.u32 15, %v2330_v10  ;;  %v646_v31 = vshrl.u32 %v2448_v60, 16  ;;  %s2934_s30 = scalar_lea.vmem %s3038_s3, %s1975_s27  ;;  %s2942_s5 = scalar_lea.vmem %s3039_s4, %s1975_s27 }
  0x21   : > { %1089 = vrot.lane.b32.xlu1 %v1044_v53, %s2238_s12  ;;  %1081 = vrot.lane.b32.xlu0 %v1040_v0, %s2238_s12  ;;  %vm1031_vm0 = vcmp.ne.s16.totalorder %v2009_v6, 0  ;;  %v718_v20 = vrot.slane %v649_v8, 1  ;;  %v986_v37 = vsel %vm966_vm4, 65537, %v2236_v2  ;;  %v298_v40 = vstv %s297_s14  ;;  %s2242_s14 = smov 18  }
  0x22   : > { %v1041_v19 = vsel %vm1031_vm0, %v716_v4, 0  ;;  %vm1036_vm5 = vcmp.ne.s16.totalorder %v2014_v18, 0  ;;  %v510_v42 = vand.u32 15, %v2337_v11  ;;  %vm613_vm6 = vsmask.f32 256 }
  0x23   : > { %v1046_v44 = vsel %vm1036_vm5, %v731_v16, 0  ;;  %v719_v46 = vsel %vm706_vm2, %v717_v15, %v718_v20  ;;  %v2010_v10 = vcombine.low %v2306_v3, %v986_v37  ;;  %v720_v47 = vor.u32 %v718_v20, %v646_v31  ;;  %v283_v18 = vld [vmem:[%s281_s25 + $0x4] sm:$0xf] }
  0x24   : > { %vm908_vm7 = vcmp.ne.s32.totalorder %v440_v21, 15  ;;  %vm299_vm8 = vcmp.eq.s32.totalorder %v298_v40, 1  ;;  %vm2497_vm9 = vcmp.ne.s32.totalorder %v510_v42, 15  ;;  %v370_v11 = vadd.s32 136, %v2303_v1 }
  0x25   : > { %1091 = vrot.lane.b32.xlu1 %v1045_v13, %s2238_s12  ;;  %1083 = vrot.lane.b32.xlu0 %v1041_v19, %s2238_s12  ;;  %vm1032_vm10 = vcmp.ne.s16.totalorder %v2010_v10, 0  ;;  %v722_v49 = vsel %vm706_vm2, %v720_v47, %v2391_v36  ;;  %vm968_vm11 = vmpackc.low %vm908_vm7, %vm908_vm7  ;;  %v300_v51 = vsel %vm299_vm8, %v288_v9, 0  ;;  %v301_v52 = vsel %vm299_vm8, %v289_v38, 0  ;;  %v282_v13 = vld [vmem:[%s281_s25] sm:$0xf] }
  0x26   : > { %v1042_v53 = vsel %vm1032_vm10, %v719_v46, 0  ;;  %v988_v54 = vsel %vm968_vm11, 65537, %v2236_v2  ;;  %v2505_v55 = vcombine.low %v300_v51, %v301_v52  ;;  %vm978_vm12 = vmpackc.low %vm2497_vm9, %vm2497_vm9  ;;  %v496_v56 = vand.u32 15, %v370_v11 }
  0x27   : > { %v2011_v57 = vcombine.low %v2306_v3, %v988_v54  ;;  %v998_v36 = vsel %vm978_vm12, 65537, %v2236_v2  ;;  %v678_v58 = vshrl.u32 %v2413_v45, 16  ;;  %v357_v59 = vadd.s32 32, %v2303_v1 }
  0x28   : > { %v689_v61 = vshll.u32 %v2505_v55, 16  ;;  %v686_v63 = vshrl.u32 %v2505_v55, 16  ;;  %v2016_v0 = vcombine.low %v2306_v3, %v998_v36  ;;  %vm916_vm13 = vcmp.ne.s32.totalorder %v496_v56, 15 }
  0x29   : > { %1093 = vrot.lane.b32.xlu1 %v1046_v44, %s2238_s12  ;;  %1085 = vrot.lane.b32.xlu0 %v1042_v53, %s2238_s12  ;;  %v2525_v4 = vrot.slane %v670_v34, 7  ;;  %vm2527_vm14 = vcmp.ne.s16.totalorder %v2011_v57, 0  ;;  %v732_v6 = vor.u32 %v2466_v7, %v678_v58  ;;  %vm976_vm15 = vmpackc.low %vm916_vm13, %vm916_vm13  ;;  %v405_v12 = vand.u32 15, %v357_v59 }
  0x2a   : > { %v2536_v14 = vrot.slane %v638_v50, 7  ;;  %v1043_v15 = vsel %vm2527_vm14, %v722_v49, 0  ;;  %v733_v34 = vrot.slane %v689_v61, 1  ;;  %vm2542_vm0 = vcmp.ne.s16.totalorder %v2016_v0, 0 }
  0x2b   : > { %v996_v50 = vsel %vm976_vm15, 65537, %v2236_v2  ;;  %vm753_vm4 = vcmp.ne.s32.totalorder %v405_v12, 0  ;;  %v624_v9 = vrot.slane %v622_v27, 7  ;;  %v292_v19 = vstv %s291_s26 }
  0x2c   : > { %v735_v20 = vor.u32 %v733_v34, %v686_v63  ;;  %v734_v21 = vsel %vm706_vm2, %v732_v6, %v733_v34  ;;  %v2015_v37 = vcombine.low %v2306_v3, %v996_v50  ;;  %vm813_vm3 = vmpackc.low %vm753_vm4, %vm753_vm4  ;;  %vm293_vm5 = vcmp.eq.s32.totalorder %v292_v19, 1 }
  0x2d   : > { %1065 = vrot.lane.b32.xlu1 %v2413_v45, %s2237_s6  ;;  %1057 = vrot.lane.b32.xlu0 %v2448_v60, %s2237_s6  ;;  %v833_v38 = vsel %vm813_vm3, 65537, %v2236_v2  ;;  %v2565_v40 = vsel %vm613_vm6, %v624_v9, %v2381_v33  ;;  %v294_v42 = vsel %vm293_vm5, %v282_v13, 0  ;;  %v295_v27 = vsel %vm293_vm5, %v283_v18, 0 }
  0x2e   : > { %v748_v44 = vsel %vm2550_vm1, %v735_v20, 0  ;;  %vm2569_vm7 = vcmp.ne.s16.totalorder %v2015_v37, 0  ;;  %v1999_v10 = vcombine.low %v833_v38, %v2306_v3  ;;  %v2574_v47 = vcombine.low %v294_v42, %v295_v27 }
  0x2f   : > { %v1048_v33 = vsel %vm2542_vm0, %v748_v44, 0  ;;  %v1047_v48 = vsel %vm2569_vm7, %v734_v21, 0  ;;  %v355_v11 = vadd.s32 16, %v2303_v1  ;;  %v627_v49 = vor.u32 %v625_v22, %v624_v9 }
  0x30   : > { %vm2586_vm8 = vcmp.ne.s16.totalorder %v1999_v10, 0  ;;  %v615_v52 = vshrl.u32 %v2574_v47, 16  ;;  %v365_v53 = vadd.s32 96, %v2303_v1  ;;  %v656_v54 = vrot.slane %v654_v29, 7 }
  0x31   : > { %1087 = vrot.lane.b32.xlu1 %v1043_v15, %s2238_s12  ;;  %1067 = vrot.lane.b32.xlu0 %v2505_v55, %s2237_s6  ;;  %v891_v56 = vsel %vm2586_vm8, %v2565_v40, 0  ;;  %v391_v57 = vand.u32 15, %v355_v11  ;;  %v667_v17 = vor.u32 %v665_v28, %v2401_v39  ;;  %v363_v22 = vadd.s32 80, %v2303_v1 }
  0x32   : > { %v2603_v36 = vrot.slane %v615_v52, 7  ;;  %v461_v59 = vand.u32 15, %v365_v53  ;;  %v648_v0 = vrot.slane %v646_v31, 7  ;;  %v659_v29 = vor.u32 %v657_v30, %v656_v54 }
  0x33   : > { %vm751_vm9 = vcmp.ne.s32.totalorder %v391_v57, 0  ;;  %v2611_v5 = vsel %vm613_vm6, %v656_v54, %v667_v17  ;;  %v447_v23 = vand.u32 15, %v363_v22  ;;  %v367_v28 = vadd.s32 112, %v2303_v1 }
  0x34   : > { %vm811_vm10 = vmpackc.low %vm751_vm9, %vm751_vm9  ;;  %v2616_v6 = vsel %vm613_vm6, %v2603_v36, %v627_v49  ;;  %vm761_vm11 = vcmp.ne.s32.totalorder %v461_v59, 0  ;;  %v2619_v31 = vsel %vm613_vm6, %v648_v0, %v659_v29  ;;  %v675_v24 = vor.u32 %v673_v32, %v2525_v4 }
  0x35   : > { %1097 = vrot.lane.b32.xlu1 %v1048_v33, %s2238_s12  ;;  %1095 = vrot.lane.b32.xlu0 %v1047_v48, %s2238_s12  ;;  %v831_v30 = vsel %vm811_vm10, 65537, %v2236_v2  ;;  %vm821_vm12 = vmpackc.low %vm761_vm11, %vm761_vm11  ;;  %vm759_vm13 = vcmp.ne.s32.totalorder %v447_v23, 0  ;;  %v475_v12 = vand.u32 15, %v367_v28  ;;  %v359_v13 = vadd.s32 48, %v2303_v1 }
  0x36   : > { %v1998_v15 = vcombine.low %v831_v30, %v2306_v3  ;;  %v841_v34 = vsel %vm821_vm12, 65537, %v2236_v2  ;;  %vm819_vm14 = vmpackc.low %vm759_vm13, %vm759_vm13  ;;  %v2630_v16 = vsel %vm613_vm6, %v2401_v39, %v675_v24  ;;  %v643_v26 = vor.u32 %v641_v43, %v2536_v14  ;;  %v2022_v30 = vld.sshfl [vmem:[%s3036_s1 + $0x14] sm:$0x1 pattern:$0x75316420] }
  0x37   : > { %v2003_v32 = vcombine.low %v841_v34, %v2306_v3  ;;  %v839_v18 = vsel %vm819_vm14, 65537, %v2236_v2  ;;  %vm763_vm15 = vcmp.ne.s32.totalorder %v475_v12, 0  ;;  %v419_v7 = vand.u32 15, %v359_v13 }
  0x38   : > { %v680_v50 = vrot.slane %v678_v58, 7  ;;  %vm2641_vm0 = vcmp.ne.s16.totalorder %v1998_v15, 0  ;;  %v2002_v39 = vcombine.low %v839_v18, %v2306_v3  ;;  %vm823_vm1 = vmpackc.low %vm763_vm15, %vm763_vm15  ;;  %v2648_v35 = vsel %vm613_vm6, %v2367_v25, %v643_v26 }
  0x39   : > { %1049 = vrot.lane.b32.xlu0 %v2574_v47, %s2237_s6  ;;  %v890_v43 = vsel %vm2641_vm0, %v2616_v6, 0  ;;  %vm2653_vm4 = vcmp.ne.s16.totalorder %v2003_v32, 0  ;;  %v843_v58 = vsel %vm823_vm1, 65537, %v2236_v2  ;;  %vm755_vm3 = vcmp.ne.s32.totalorder %v419_v7, 0 }
  0x3a   : > { %v688_v20 = vrot.slane %v686_v63, 7  ;;  %v895_v21 = vsel %vm2653_vm4, %v2611_v5, 0  ;;  %vm2663_vm5 = vcmp.ne.s16.totalorder %v2002_v39, 0  ;;  %v2004_v37 = vcombine.low %v843_v58, %v2306_v3  ;;  %vm815_vm7 = vmpackc.low %vm755_vm3, %vm755_vm3 }
  0x3b   : > { %v894_v38 = vsel %vm2663_vm5, %v2619_v31, 0  ;;  %v835_v42 = vsel %vm815_vm7, 65537, %v2236_v2  ;;  %v354_v27 = vadd.s32 8, %v2303_v1  ;;  %v618_v63 = vshll.u32 %v2574_v47, 16 }
  0x3c   : > { %vm2674_vm9 = vcmp.ne.s16.totalorder %v2004_v37, 0  ;;  %v2000_v46 = vcombine.low %v835_v42, %v2306_v3  ;;  %v369_v10 = vadd.s32 128, %v2303_v1  ;;  %v683_v33 = vor.u32 %v681_v62, %v680_v50 }
  0x3d   : > { %v896_v48 = vsel %vm2674_vm9, %v2630_v16, 0  ;;  %v384_v11 = vand.u32 15, %v354_v27  ;;  %v707_v49 = vrot.slane %v618_v63, 1  ;;  %v361_v53 = vadd.s32 64, %v2303_v1 }
  0x3e   : > { %vm2686_vm10 = vcmp.ne.s16.totalorder %v2000_v46, 0  ;;  %v489_v57 = vand.u32 15, %v369_v10  ;;  %v2692_v17 = vsel %vm613_vm6, %v2525_v4, %v683_v33  ;;  %v651_v45 = vor.u32 %v649_v8, %v648_v0 }
  0x3f   : > { %v892_v62 = vsel %vm2686_vm10, %v2648_v35, 0  ;;  %v708_v22 = vor.u32 %v707_v49, %v615_v52  ;;  %vm900_vm11 = vcmp.ne.s32.totalorder %v384_v11, 15  ;;  %v433_v59 = vand.u32 15, %v361_v53 }
  0x40   : > { %vm960_vm12 = vmpackc.low %vm900_vm11, %vm900_vm11  ;;  %vm765_vm13 = vcmp.ne.s32.totalorder %v489_v57, 0  ;;  %v2703_v29 = vsel %vm613_vm6, %v2536_v14, %v651_v45  ;;  %v371_v4 = vadd.s32 144, %v2303_v1  ;;  %v691_v60 = vor.u32 %v689_v61, %v688_v20  ;;  %v2017_v53 = vld.sshfl [vmem:[%s3036_s1] sm:$0x33 pattern:$0x75316420] }
  0x41   : > { %v710_v8 = vsel %vm706_vm2, %v708_v22, %v2406_v41  ;;  %v980_v0 = vsel %vm960_vm12, 65537, %v2236_v2  ;;  %vm825_vm14 = vmpackc.low %vm765_vm13, %vm765_vm13  ;;  %vm757_vm15 = vcmp.ne.s32.totalorder %v433_v59, 0  ;;  %v377_v47 = vand.u32 15, %v2303_v1 }
  0x42   : > { %v2007_v52 = vcombine.low %v2306_v3, %v980_v0  ;;  %v845_v23 = vsel %vm825_vm14, 65537, %v2236_v2  ;;  %vm817_vm1 = vmpackc.low %vm757_vm15, %vm757_vm15  ;;  %v503_v14 = vand.u32 15, %v371_v4  ;;  %v2715_v28 = vsel %vm613_vm6, %v680_v50, %v691_v60  ;;  %v2020_v0 = vld.sshfl [vmem:[%s3036_s1 + $0xc] sm:$0x1 pattern:$0x75316420] }
  0x43   : > { %v2005_v55 = vcombine.low %v845_v23, %v2306_v3  ;;  %v837_v61 = vsel %vm817_vm1, 65537, %v2236_v2  ;;  %v620_v41 = vor.u32 %v618_v63, %v2603_v36  ;;  %vm703_vm2 = vcmask 1040384  }
  0x44   : > { %vm1029_vm3 = vcmp.ne.s16.totalorder %v2007_v52, 0  ;;  %v2001_v24 = vcombine.low %v837_v61, %v2306_v3  ;;  %vm767_vm7 = vcmp.ne.s32.totalorder %v503_v14, 0  ;;  %vm2722_vm11 = vmand %vm703_vm2, %vm613_vm6  ;;  %vm749_vm12 = vcmp.ne.s32.totalorder %v377_v47, 0 }
  0x45   : > { %v1039_v12 = vsel %vm1029_vm3, %v710_v8, 0  ;;  %vm2726_vm13 = vcmp.ne.s16.totalorder %v2005_v55, 0  ;;  %vm827_vm14 = vmpackc.low %vm767_vm7, %vm767_vm7  ;;  %v705_v7 = vsel %vm2722_vm11, 0, %v620_v41  ;;  %v2239_v37 = vmov 1966171168  }
  0x46   : > { %1079 = vrot.lane.b32.xlu1 %v1039_v12, %s2238_s12  ;;  %v897_v36 = vsel %vm2726_vm13, %v2692_v17, 0  ;;  %vm2734_vm15 = vcmp.ne.s16.totalorder %v2001_v24, 0  ;;  %v847_v34 = vsel %vm827_vm14, 65537, %v2236_v2  ;;  %vm809_vm6 = vmpackc.low %vm749_vm12, %vm749_vm12  ;;  %v1285_v42 = vunpack.c.l.s4 %v2239_v37 }
  0x47   : > { %v893_v26 = vsel %vm2734_vm15, %v2703_v29, 0  ;;  %v2006_v32 = vcombine.low %v847_v34, %v2306_v3  ;;  %v829_v18 = vsel %vm809_vm6, 65537, %v2236_v2  ;;  %v1283_v57 = vcombine.high %v2017_v53, %v2017_v53  ;;  %v2021_v55 = vld.sshfl [vmem:[%s3036_s1 + $0x10] sm:$0x33 pattern:$0x75316420] }
  0x48   : > { %v1997_v50 = vcombine.low %v829_v18, %v2306_v3  ;;  %v1286_v27 = vunpack.c.0.s8 %v1285_v42  ;;  %v2019_v3 = vld.sshfl [vmem:[%s3036_s1 + $0x8] sm:$0x33 pattern:$0x75316420]  ;;  %vm1099_vm3 = vcmask 23552   ;;  %vm1130_vm7 = vcmask 48128  }
  0x49   : > { %vm2747_vm1 = vcmp.ne.s16.totalorder %v2006_v32, 0  ;;  %v1321_v63 = vcombine.high %v2019_v3, %v2019_v3  ;;  %v1359_v32 = vcombine.high %v2021_v55, %v2021_v55  ;;  %vm1161_vm11 = vcmask 72704  }
  0x4a   : > { %v898_v58 = vsel %vm2747_vm1, %v2715_v28, 0  ;;  %vm879_vm2 = vcmp.ne.s16.totalorder %v1997_v50, 0  ;;  %v2757_v2 = vsub.s32 %v1286_v27, %v2303_v1  ;;  %v2018_v1 = vld.sshfl [vmem:[%s3036_s1 + $0x4] sm:$0x1 pattern:$0x75316420] }
  0x4b   : > { %v2754_v20 = vsel %vm879_vm2, %v705_v7, 0  ;;  %vm1545_vm0 = vcmask 1044480   ;;  %vm1546_vm4 = vcmask 1045504   ;;  %vm1247_vm8 = vcmask 146432  }
  0x4c   : > { %v1328_v46 = vrot.slane %v2019_v3, %v2757_v2  ;;  %v1335_v11 = vrot.slane %v1321_v63, %v2757_v2  ;;  %v1313_v60 = vrot.slane %v2018_v1, %v2757_v2  ;;  %v1290_v52 = vrot.slane %v2017_v53, %v2757_v2 }
  0x4d   : > { %v1297_v23 = vrot.slane %v1283_v57, %v2757_v2  ;;  %v1366_v37 = vrot.slane %v2021_v55, %v2757_v2  ;;  %v1389_v42 = vrot.slane %v2022_v30, %v2757_v2  ;;  %vm1528_vm5 = vcmask 220160  }
  0x4e   : > { %v1336_v49 = vcombine.high %v1328_v46, %v1328_v46  ;;  %v1337_v45 = vcombine.high %v1335_v11, %v1335_v11  ;;  %v1400_v22 = vunpack.i.h.s16 %v1328_v46  ;;  %v1402_v59 = vunpack.i.h.s16 %v1335_v11 }
  0x4f   : > { %v2024_v61 = vpack.i.b16 %v1328_v46, %v1313_v60  ;;  %v1438_v12 = vcombine.low %v1290_v52, %v1297_v23  ;;  %v2029_v34 = vcombine.high %v1290_v52, %v1297_v23  ;;  %v1351_v46 = vrot.slane %v2020_v0, %v2757_v2 }
  0x50   : > { %v1404_v8 = vunpack.i.h.s16 %v1336_v49  ;;  %v2025_v14 = vpack.i.b16 %v1335_v11, %v1400_v22  ;;  %v2026_v41 = vpack.i.b16 %v1336_v49, %v1402_v59  ;;  %v1373_v11 = vrot.slane %v1359_v32, %v2757_v2 }
  0x51   : > { %v1448_v3 = vrot.slane %v1438_v12, %v2757_v2  ;;  %v1455_v63 = vrot.slane %v2029_v34, %v2757_v2  ;;  %v1374_v1 = vcombine.high %v1366_v37, %v1366_v37  ;;  %v1406_v59 = vunpack.i.h.s16 %v1337_v45 }
  0x52   : > { %v2027_v24 = vpack.i.b16 %v1337_v45, %v1404_v8  ;;  %v1440_v7 = vcombine.low %v2024_v61, %v2025_v14  ;;  %v1375_v22 = vcombine.high %v1373_v11, %v1373_v11  ;;  %v1416_v60 = vunpack.i.l.s16 %v1389_v42 }
  0x53   : > { %v1470_v57 = vcombine.low %v1448_v3, %v1455_v63  ;;  %v1488_v23 = vcombine.low %v1373_v11, %v1374_v1  ;;  %v2028_v61 = vpack.i.b16 %v1351_v46, %v1406_v59  ;;  %v2240_v32 = vmov 65535  }
  0x54   : > { %v1441_v50 = vcombine.low %v2026_v41, %v2027_v24  ;;  %v1462_v49 = vrot.slane %v1440_v7, %v2757_v2  ;;  %v1489_v41 = vcombine.low %v1375_v22, %v1416_v60  ;;  %v1547_v7 = vsel %vm1545_vm0, 4294967295, %v2240_v32 }
  0x55   : > { %v1478_v55 = vrot.slane %v1470_v57, %v2757_v2  ;;  %v1503_v24 = vrot.slane %v1488_v23, %v2757_v2  ;;  %v1548_v44 = vsel %vm1546_vm4, %v1547_v7, 0  ;;  %vm1713_vm9 = vcmask 519168  }
  0x56   : > { %v1469_v53 = vrot.slane %v1441_v50, %v2757_v2  ;;  %v1510_v30 = vrot.slane %v1489_v41, %v2757_v2 }
  0x58   : > { %v1471_v0 = vcombine.low %v1462_v49, %v1469_v53 }
  0x5a   : > { %v1485_v25 = vrot.slane %v1471_v0, %v2757_v2 }
  0x87   : > { %v2763_v10 = vpop.permute.xlu1 %1053  ;;  %v1052_v33 = vpop.permute.xlu0 %1051 }
  0x88   : > { %v1105_v45 = vsel %vm1099_vm3, %v890_v43, %v1052_v33  ;;  %v1486_v43 = vcombine.low %v1478_v55, %v1485_v25  ;;  %v1108_v19 = vsel %vm1099_vm3, %v891_v56, %v2763_v10 }
  0x8a   : > { %2115 = vmatprep.subr.bf16.mxu0 %v1486_v43  ;;  %2135 = vmatprep.subr.bf16.mxu1 %v1486_v43 }
  0x8b   : > { %v1062_v4 = vpop.permute.xlu1 %1061  ;;  %v1060_v47 = vpop.permute.xlu0 %1059  ;;  %2116 = vmatpush3.bf16.msra.mxu0 %v1486_v43  ;;  %2137 = vmatpush3.bf16.msra.mxu1 %v1486_v43 }
  0x8c   : > { %v1117_v8 = vsel %vm1099_vm3, %v894_v38, %v1060_v47  ;;  %v1487_v47 = vcombine.low %v2028_v61, %v1366_v37  ;;  %v1120_v6 = vsel %vm1099_vm3, %v895_v21, %v1062_v4  ;;  %v1525_v21 = vrot.slane %v1510_v30, %v2757_v2 }
  0x8e   : > { %v1496_v12 = vrot.slane %v1487_v47, %v2757_v2 }
  0x8f   : > { %v1064_v18 = vpop.permute.xlu1 %1063  ;;  %v1056_v27 = vpop.permute.xlu0 %1055 }
  0x90   : > { %v1511_v34 = vcombine.low %v1496_v12, %v1503_v24  ;;  %v1123_v40 = vsel %vm1099_vm3, %v896_v48, %v1064_v18  ;;  %v1111_v16 = vsel %vm1099_vm3, %v892_v62, %v1056_v27 }
  0x92   : > { %v1518_v50 = vrot.slane %v1511_v34, %v2757_v2 }
  0x93   : > { %v1090_v52 = vpop.permute.xlu1 %1089  ;;  %v1082_v31 = vpop.permute.xlu0 %1081 }
  0x94   : > { %v1147_v14 = vsel %vm1130_vm7, %v1117_v8, %v1090_v52  ;;  %v1135_v38 = vsel %vm1130_vm7, %v1105_v45, %v1082_v31  ;;  %v1526_v37 = vcombine.low %v1518_v50, %v1525_v21  ;;  %v2928_v50 = vld [vmem:[%s3037_s2] ss:$0 sm:$0xff] }
  0x95   : > { %1167 = vst.msk [vmem:[#allocation2 + $0x28] sm:$0xff] %vm1161_vm11, %v1147_v14  ;;  %1163 = vst.msk [vmem:[#allocation2 + $0x8] sm:$0xff] %vm1161_vm11, %v1135_v38 }
  0x96   : > { %v1550_v63 = vand.u32 %v1548_v44, %v1526_v37 }
  0x97   : > { %v1092_v9 = vpop.permute.xlu1 %1091  ;;  %v1084_v5 = vpop.permute.xlu0 %1083 }
  0x98   : > { %v1150_v33 = vsel %vm1130_vm7, %v1120_v6, %v1092_v9  ;;  %v1138_v4 = vsel %vm1130_vm7, %v1108_v19, %v1084_v5  ;;  %2117 = vmatprep.subr.bf16.mxu0 %v1550_v63  ;;  %2136 = vmatprep.subr.bf16.mxu1 %v1550_v63 }
  0x99   : > { %1168 = vst.msk [vmem:[#allocation2 + $0x30] sm:$0xff] %vm1161_vm11, %v1150_v33  ;;  %1164 = vst.msk [vmem:[#allocation2 + $0x10] sm:$0xff] %vm1161_vm11, %v1138_v4  ;;  %2118 = vmatpush3.bf16.msra.mxu0 %v1550_v63  ;;  %2138 = vmatpush3.bf16.msra.mxu1 %v1550_v63 }
  0x9b   : > { %v1094_v51 = vpop.permute.xlu1 %1093  ;;  %v1086_v48 = vpop.permute.xlu0 %1085 }
  0x9c   : > { %v1153_v56 = vsel %vm1130_vm7, %v1123_v40, %v1094_v51  ;;  %v2833_v10 = vld [vmem:[#allocation2 + $0x28] sm:$0xff]  ;;  %v1141_v42 = vsel %vm1130_vm7, %v1111_v16, %v1086_v48 }
  0x9d   : > { %1169 = vst.msk [vmem:[#allocation2 + $0x38] sm:$0xff] %vm1161_vm11, %v1153_v56  ;;  %1198 = vrot.lane.b32.xlu1 %v2833_v10, %s2241_s13  ;;  %v2844_v18 = vld [vmem:[#allocation2 + $0x8] sm:$0xff]  ;;  %1165 = vst.msk [vmem:[#allocation2 + $0x18] sm:$0xff] %vm1161_vm11, %v1141_v42 }
  0x9e   : > { %1190 = vrot.lane.b32.xlu0 %v2844_v18, %s2241_s13 }
  0x9f   : > { %v1066_v2 = vpop.permute.xlu1 %1065  ;;  %v1058_v35 = vpop.permute.xlu0 %1057 }
  0xa0   : > { %v2850_v3 = vld [vmem:[#allocation2 + $0x30] sm:$0xff]  ;;  %v1114_v62 = vsel %vm1099_vm3, %v893_v26, %v1058_v35  ;;  %v1126_v39 = vsel %vm1099_vm3, %v897_v36, %v1066_v2 }
  0xa1   : > { %1200 = vrot.lane.b32.xlu1 %v2850_v3, %s2241_s13  ;;  %v2854_v54 = vld [vmem:[#allocation2 + $0x10] sm:$0xff] }
  0xa2   : > { %1192 = vrot.lane.b32.xlu0 %v2854_v54, %s2241_s13 }
  0xa3   : > { %v1088_v27 = vpop.permute.xlu1 %1087  ;;  %v1068_v11 = vpop.permute.xlu0 %1067 }
  0xa4   : > { %v1144_v46 = vsel %vm1130_vm7, %v1114_v62, %v1088_v27  ;;  %v1129_v29 = vsel %vm1099_vm3, %v898_v58, %v1068_v11  ;;  %v2873_v49 = vld [vmem:[#allocation2 + $0x38] sm:$0xff] }
  0xa5   : > { %1166 = vst.msk [vmem:[#allocation2 + $0x20] sm:$0xff] %vm1161_vm11, %v1144_v46  ;;  %1215 = vrot.lane.b32.xlu1 %v2850_v3, %s2242_s14  ;;  %v1175_v53 = vld [vmem:[#allocation2 + $0x18] sm:$0xff] }
  0xa6   : > { %1207 = vrot.lane.b32.xlu0 %v2854_v54, %s2242_s14 }
  0xa7   : > { %v1098_v15 = vpop.permute.xlu1 %1097  ;;  %v1096_v28 = vpop.permute.xlu0 %1095 }
  0xa8   : > { %v1159_v26 = vsel %vm1130_vm7, %v1129_v29, %v1098_v15  ;;  %v1156_v58 = vsel %vm1130_vm7, %v1126_v39, %v1096_v28 }
  0xa9   : > { %1171 = vst.msk [vmem:[#allocation2 + $0x48] sm:$0xff] %vm1161_vm11, %v1159_v26  ;;  %1217 = vrot.lane.b32.xlu1 %v2873_v49, %s2242_s14  ;;  %1170 = vst.msk [vmem:[#allocation2 + $0x40] sm:$0xff] %vm1161_vm11, %v1156_v58 }
  0xaa   : > { %1209 = vrot.lane.b32.xlu0 %v1175_v53, %s2242_s14 }
  0xab   : > { %v1050_v17 = vpop.permute.xlu0 %1049 }
  0xac   : > { %v1176_v1 = vld [vmem:[#allocation2 + $0x20] sm:$0xff]  ;;  %v1102_v36 = vsel %vm1099_vm3, %v2754_v20, %v1050_v17 }
  0xad   : > { %1202 = vrot.lane.b32.xlu1 %v2873_v49, %s2241_s13 }
  0xae   : > { %1194 = vrot.lane.b32.xlu0 %v1175_v53, %s2241_s13 }
  0xb0   : > { %v1180_v57 = vld [vmem:[#allocation2 + $0x40] sm:$0xff]  ;;  %v1181_v13 = vld [vmem:[#allocation2 + $0x48] sm:$0xff] }
  0xb1   : > { %1204 = vrot.lane.b32.xlu1 %v1180_v57, %s2241_s13 }
  0xb2   : > { %1196 = vrot.lane.b32.xlu0 %v1176_v1, %s2241_s13 }
  0xb5   : > { %1219 = vrot.lane.b32.xlu1 %v1180_v57, %s2242_s14 }
  0xb6   : > { %1211 = vrot.lane.b32.xlu0 %v1176_v1, %s2242_s14 }
  0xb8   : > { %v1080_v22 = vpop.permute.xlu1 %1079 }
  0xb9   : > { %1221 = vrot.lane.b32.xlu1 %v1181_v13, %s2242_s14  ;;  %v1132_v59 = vsel %vm1130_vm7, %v1102_v36, %v1080_v22 }
  0xba   : > { %1213 = vrot.lane.b32.xlu0 %v2833_v10, %s2242_s14  ;;  %1162 = vst.msk [vmem:[#allocation2] sm:$0xff] %vm1161_vm11, %v1132_v59 }
  0xc1   : > { %v1172_v23 = vld [vmem:[#allocation2] sm:$0xff] }
 0x10f   : > { %v1199_v60 = vpop.permute.xlu1 %1198 }
 0x110   : > { %v1191_v8 = vpop.permute.xlu0 %1190  ;;  %v1237_v14 = vsel %vm1161_vm11, %v1176_v1, %v1199_v60 }
 0x111   : > { %v1225_v20 = vsel %vm1161_vm11, %v1172_v23, %v1191_v8 }
 0x113   : > { %v1201_v52 = vpop.permute.xlu1 %1200 }
 0x114   : > { %v1193_v0 = vpop.permute.xlu0 %1192  ;;  %v1240_v31 = vsel %vm1161_vm11, %v2833_v10, %v1201_v52 }
 0x115   : > { %v1228_v47 = vsel %vm1161_vm11, %v2844_v18, %v1193_v0 }
 0x117   : > { %v1216_v55 = vpop.permute.xlu1 %1215 }
 0x118   : > { %v1257_v61 = vsel %vm1247_vm8, %v1237_v14, %v1216_v55  ;;  %v1208_v41 = vpop.permute.xlu0 %1207 }
 0x119   : > { %2127 = vmatprep.mubr.msk.bf16.mxu1 %vm1528_vm5, %v1257_v61  ;;  %v1249_v45 = vsel %vm1247_vm8, %v1225_v20, %v1208_v41 }
 0x11a   : > { %2119 = vmatprep.mubr.msk.bf16.mxu0 %vm1528_vm5, %v1249_v45 }
 0x11b   : > { %v1218_v25 = vpop.permute.xlu1 %1217 }
 0x11c   : > { %v1259_v38 = vsel %vm1247_vm8, %v1240_v31, %v1218_v25  ;;  %v1210_v24 = vpop.permute.xlu0 %1209 }
 0x11d   : > { %2128 = vmatmul.mubr.msk.bf16.vlgmr.msra.gmra.mrb[0].mxu1 %vm1528_vm5, %v1259_v38  ;;  %v1251_v30 = vsel %vm1247_vm8, %v1228_v47, %v1210_v24 }
 0x11e   : > { %2120 = vmatmul.mubr.msk.bf16.vlgmr.msra.gmra.mrb[0].mxu0 %vm1528_vm5, %v1251_v30 }
 0x11f   : > { %v1203_v6 = vpop.permute.xlu1 %1202 }
 0x120   : > { %v1195_v9 = vpop.permute.xlu0 %1194  ;;  %v1243_v5 = vsel %vm1161_vm11, %v2850_v3, %v1203_v6 }
 0x121   : > { %v1231_v12 = vsel %vm1161_vm11, %v2854_v54, %v1195_v9 }
 0x123   : > { %v1205_v33 = vpop.permute.xlu1 %1204 }
 0x124   : > { %v1197_v43 = vpop.permute.xlu0 %1196  ;;  %v1246_v40 = vsel %vm1161_vm11, %v2873_v49, %v1205_v33 }
 0x125   : > { %v1234_v32 = vsel %vm1161_vm11, %v1175_v53, %v1197_v43 }
 0x127   : > { %v1220_v21 = vpop.permute.xlu1 %1219 }
 0x128   : > { %v1212_v19 = vpop.permute.xlu0 %1211  ;;  %v1261_v34 = vsel %vm1247_vm8, %v1243_v5, %v1220_v21 }
 0x129   : > { %v1253_v4 = vsel %vm1247_vm8, %v1231_v12, %v1212_v19  ;;  %2131 = vmatprep.mubr.msk.bf16.mxu1 %vm1528_vm5, %v1261_v34 }
 0x12a   : > { %2123 = vmatprep.mubr.msk.bf16.mxu0 %vm1528_vm5, %v1253_v4 }
 0x12b   : > { %v1222_v51 = vpop.permute.xlu1 %1221 }
 0x12c   : > { %v1214_v7 = vpop.permute.xlu0 %1213  ;;  %v1263_v10 = vsel %vm1247_vm8, %v1246_v40, %v1222_v51 }
 0x12d   : > { %v1255_v56 = vsel %vm1247_vm8, %v1234_v32, %v1214_v7  ;;  %2132 = vmatmul.mubr.msk.bf16.gmra.mrb[4].mxu1 %vm1528_vm5, %v1263_v10 }
 0x12e   : > { %2124 = vmatmul.mubr.msk.bf16.gmra.mrb[4].mxu0 %vm1528_vm5, %v1255_v56 }
 0x1f0   : > { %v2129_v44 = vpop.f32.mrb[0].mxu1 }
 0x1f1   : > { %v1627_v16 = vadd.f32 %v2129_v44, %v2928_v50  ;;  %v1618_v48 = vpop.f32.mrb[1].mxu1  ;;  %v2121_v18 = vpop.f32.mrb[0].mxu0 }
 0x1f2   : > { %v1619_v37 = vadd.f32 %v2928_v50, %v1618_v48  ;;  %v2130_v42 = vpop.f32.mrb[2].mxu1  ;;  %v1595_v2 = vadd.f32 %v2121_v18, %v2928_v50  ;;  %v1586_v35 = vpop.f32.mrb[1].mxu0 }
 0x1f3   : > { %v2083_v3 = vpack.c.bf16 %v1627_v16, %v1627_v16  ;;  %v1740_v63 = vmax.f32 %v1627_v16, 0.0  ;;  %v1630_v54 = vadd.f32 %v2130_v42, %v2928_v50  ;;  %v1621_v62 = vpop.f32.mrb[3].mxu1  ;;  %v1587_v27 = vadd.f32 %v2928_v50, %v1586_v35  ;;  %v2122_v29 = vpop.f32.mrb[2].mxu0 }
 0x1f4   : > { %v2081_v46 = vpack.c.bf16 %v1619_v37, %v1619_v37  ;;  %v1738_v11 = vmax.f32 %v1619_v37, 0.0  ;;  %v1622_v15 = vadd.f32 %v2928_v50, %v1621_v62  ;;  %v2075_v26 = vpack.c.bf16 %v1595_v2, %v1595_v2  ;;  %v1589_v53 = vpop.f32.mrb[3].mxu0 }
 0x1f5   : > { %v1732_v49 = vmax.f32 %v1595_v2, 0.0  ;;  %1724 = vst.msk [vmem:[%s2934_s30 + $0x28] sm:$0xf] %vm1713_vm9, %v2083_v3  ;;  %v2099_v39 = vpack.c.bf16 %v1740_v63, %v1740_v63  ;;  %v1598_v28 = vadd.f32 %v2122_v29, %v2928_v50  ;;  %v2073_v58 = vpack.c.bf16 %v1587_v27, %v1587_v27 }
 0x1f6   : > { %v1730_v1 = vmax.f32 %v1587_v27, 0.0  ;;  %1722 = vst.msk [vmem:[%s2934_s30 + $0x20] sm:$0xf] %vm1713_vm9, %v2081_v46  ;;  %v2097_v57 = vpack.c.bf16 %v1738_v11, %v1738_v11  ;;  %v2084_v17 = vpack.c.bf16 %v1630_v54, %v1630_v54  ;;  %1716 = vst.msk [vmem:[%s2934_s30 + $0x8] sm:$0xf] %vm1713_vm9, %v2075_v26  ;;  %v1741_v59 = vmax.f32 %v1630_v54, 0.0 }
 0x1f7   : > { %v2091_v13 = vpack.c.bf16 %v1732_v49, %v1732_v49  ;;  %1820 = vst.msk [vmem:[%s2942_s5 + $0x28] sm:$0xf] %vm1713_vm9, %v2099_v39  ;;  %v2076_v36 = vpack.c.bf16 %v1598_v28, %v1598_v28  ;;  %v1733_v22 = vmax.f32 %v1598_v28, 0.0  ;;  %1714 = vst.msk [vmem:[%s2934_s30] sm:$0xf] %vm1713_vm9, %v2073_v58  ;;  %v1590_v8 = vadd.f32 %v2928_v50, %v1589_v53 }
 0x1f8   : > { %v2089_v60 = vpack.c.bf16 %v1730_v1, %v1730_v1  ;;  %1818 = vst.msk [vmem:[%s2942_s5 + $0x20] sm:$0xf] %vm1713_vm9, %v2097_v57  ;;  %1725 = vst.msk [vmem:[%s2934_s30 + $0x2c] sm:$0xf] %vm1713_vm9, %v2084_v17  ;;  %v2082_v52 = vpack.c.bf16 %v1622_v15, %v1622_v15  ;;  %v1739_v0 = vmax.f32 %v1622_v15, 0.0  ;;  %v2100_v14 = vpack.c.bf16 %v1741_v59, %v1741_v59 }
 0x1f9   : > { %1812 = vst.msk [vmem:[%s2942_s5 + $0x8] sm:$0xf] %vm1713_vm9, %v2091_v13  ;;  %1717 = vst.msk [vmem:[%s2934_s30 + $0xc] sm:$0xf] %vm1713_vm9, %v2076_v36  ;;  %v2092_v23 = vpack.c.bf16 %v1733_v22, %v1733_v22  ;;  %v2074_v55 = vpack.c.bf16 %v1590_v8, %v1590_v8  ;;  %v1731_v61 = vmax.f32 %v1590_v8, 0.0 }
 0x1fa   : > { %1810 = vst.msk [vmem:[%s2942_s5] sm:$0xf] %vm1713_vm9, %v2089_v60  ;;  %1723 = vst.msk [vmem:[%s2934_s30 + $0x24] sm:$0xf] %vm1713_vm9, %v2082_v52  ;;  %v2098_v20 = vpack.c.bf16 %v1739_v0, %v1739_v0 }
 0x1fb   : > { %1813 = vst.msk [vmem:[%s2942_s5 + $0xc] sm:$0xf] %vm1713_vm9, %v2092_v23  ;;  %1821 = vst.msk [vmem:[%s2942_s5 + $0x2c] sm:$0xf] %vm1713_vm9, %v2100_v14  ;;  %v2090_v41 = vpack.c.bf16 %v1731_v61, %v1731_v61 }
 0x1fc   : > { %1715 = vst.msk [vmem:[%s2934_s30 + $0x4] sm:$0xf] %vm1713_vm9, %v2074_v55  ;;  %1819 = vst.msk [vmem:[%s2942_s5 + $0x24] sm:$0xf] %vm1713_vm9, %v2098_v20 }
 0x1fd   : > { %1811 = vst.msk [vmem:[%s2942_s5 + $0x4] sm:$0xf] %vm1713_vm9, %v2090_v41 }
 0x200   : > { %v2133_v25 = vpop.f32.mrb[4].mxu1 }
 0x201   : > { %v2125_v45 = vpop.f32.mrb[4].mxu0  ;;  %v1643_v47 = vadd.f32 %v2133_v25, %v2928_v50  ;;  %v1634_v30 = vpop.f32.mrb[5].mxu1 }
 0x202   : > { %v1611_v31 = vadd.f32 %v2125_v45, %v2928_v50  ;;  %v1602_v38 = vpop.f32.mrb[5].mxu0  ;;  %v1635_v33 = vadd.f32 %v2928_v50, %v1634_v30  ;;  %v2134_v19 = vpop.f32.mrb[6].mxu1 }
 0x203   : > { %v1603_v24 = vadd.f32 %v2928_v50, %v1602_v38  ;;  %v2126_v6 = vpop.f32.mrb[6].mxu0  ;;  %v2087_v21 = vpack.c.bf16 %v1643_v47, %v1643_v47  ;;  %v1744_v4 = vmax.f32 %v1643_v47, 0.0  ;;  %v1637_v7 = vpop.f32.mrb[7].mxu1  ;;  %v1646_v18 = vadd.f32 %v2134_v19, %v2928_v50 }
 0x204   : > { %v2079_v9 = vpack.c.bf16 %v1611_v31, %v1611_v31  ;;  %v1736_v43 = vmax.f32 %v1611_v31, 0.0  ;;  %v1614_v12 = vadd.f32 %v2126_v6, %v2928_v50  ;;  %v1605_v5 = vpop.f32.mrb[7].mxu0  ;;  %v2085_v51 = vpack.c.bf16 %v1635_v33, %v1635_v33 }
 0x205   : > { %v2077_v34 = vpack.c.bf16 %v1603_v24, %v1603_v24  ;;  %v1734_v32 = vmax.f32 %v1603_v24, 0.0  ;;  %v1742_v56 = vmax.f32 %v1635_v33, 0.0  ;;  %1728 = vst.msk [vmem:[%s2934_s30 + $0x38] sm:$0xf] %vm1713_vm9, %v2087_v21  ;;  %v2103_v44 = vpack.c.bf16 %v1744_v4, %v1744_v4 }
 0x206   : > { %1720 = vst.msk [vmem:[%s2934_s30 + $0x18] sm:$0xf] %vm1713_vm9, %v2079_v9  ;;  %v2095_v40 = vpack.c.bf16 %v1736_v43, %v1736_v43  ;;  %v2080_v10 = vpack.c.bf16 %v1614_v12, %v1614_v12  ;;  %v1737_v48 = vmax.f32 %v1614_v12, 0.0  ;;  %1726 = vst.msk [vmem:[%s2934_s30 + $0x30] sm:$0xf] %vm1713_vm9, %v2085_v51  ;;  %v1606_v42 = vadd.f32 %v2928_v50, %v1605_v5 }
 0x207   : > { %1718 = vst.msk [vmem:[%s2934_s30 + $0x10] sm:$0xf] %vm1713_vm9, %v2077_v34  ;;  %v2093_v16 = vpack.c.bf16 %v1734_v32, %v1734_v32  ;;  %v2101_v37 = vpack.c.bf16 %v1742_v56, %v1742_v56  ;;  %v1638_v2 = vadd.f32 %v2928_v50, %v1637_v7  ;;  %1824 = vst.msk [vmem:[%s2942_s5 + $0x38] sm:$0xf] %vm1713_vm9, %v2103_v44  ;;  %v1745_v35 = vmax.f32 %v1646_v18, 0.0 }
 0x208   : > { %1816 = vst.msk [vmem:[%s2942_s5 + $0x18] sm:$0xf] %vm1713_vm9, %v2095_v40  ;;  %1721 = vst.msk [vmem:[%s2934_s30 + $0x1c] sm:$0xf] %vm1713_vm9, %v2080_v10  ;;  %v2096_v3 = vpack.c.bf16 %v1737_v48, %v1737_v48  ;;  %v2088_v63 = vpack.c.bf16 %v1646_v18, %v1646_v18  ;;  %v2078_v54 = vpack.c.bf16 %v1606_v42, %v1606_v42  ;;  %v1735_v62 = vmax.f32 %v1606_v42, 0.0 }
 0x209   : > { %1814 = vst.msk [vmem:[%s2942_s5 + $0x10] sm:$0xf] %vm1713_vm9, %v2093_v16  ;;  %1822 = vst.msk [vmem:[%s2942_s5 + $0x30] sm:$0xf] %vm1713_vm9, %v2101_v37  ;;  %v2086_v27 = vpack.c.bf16 %v1638_v2, %v1638_v2  ;;  %v1743_v46 = vmax.f32 %v1638_v2, 0.0  ;;  %v2104_v50 = vpack.c.bf16 %v1745_v35, %v1745_v35 }
 0x20a   : > { %1817 = vst.msk [vmem:[%s2942_s5 + $0x1c] sm:$0xf] %vm1713_vm9, %v2096_v3  ;;  %1729 = vst.msk [vmem:[%s2934_s30 + $0x3c] sm:$0xf] %vm1713_vm9, %v2088_v63  ;;  %v2094_v11 = vpack.c.bf16 %v1735_v62, %v1735_v62 }
 0x20b   : > { %1719 = vst.msk [vmem:[%s2934_s30 + $0x14] sm:$0xf] %vm1713_vm9, %v2078_v54  ;;  %1727 = vst.msk [vmem:[%s2934_s30 + $0x34] sm:$0xf] %vm1713_vm9, %v2086_v27  ;;  %v2102_v29 = vpack.c.bf16 %v1743_v46, %v1743_v46 }
 0x20c   : > { %1825 = vst.msk [vmem:[%s2942_s5 + $0x3c] sm:$0xf] %vm1713_vm9, %v2104_v50  ;;  %1815 = vst.msk [vmem:[%s2942_s5 + $0x14] sm:$0xf] %vm1713_vm9, %v2094_v11 }
 0x20d   : > { %1823 = vst.msk [vmem:[%s2942_s5 + $0x34] sm:$0xf] %vm1713_vm9, %v2102_v29 }
 0x20e PF: > { %s15_s19 = sadd.s32 1, %s2233_s19   ;;  %s3074_s15 = smov %s2225_s17 }
 0x20f   : > { %p12_p11 = scmp.ge.s32.totalorder %s15_s19, 6   ;;  %s3075_s16 = smov %s2229_s18 }
 0x210   : > { %s3076_s17 = smov %s3079_s20  ;;  %s3077_s18 = smov %s3083_s21 }
 0x211   :  { %14 = sbr.rel (!%p12_p11) target bundleno = 3 (0x3), region = 77 }

// kernel: tpu_custom_call.1
= control target key start
LH: loop header
LB: loop body
LE: loop exit
PB: predicated region body
PF: predicated region fallthrough
CT: control target
= control target key end

     0   :  { %s2268_s15 = smov 0   ;;  %s2270_s16 = smov 0   ;;  %s3035_s0 = inlined_call_operand.vmem [shape: bf16[2,256,3], index: 0, kind: input, shape index: {}]   ;;  %s3036_s1 = inlined_call_operand.vmem [shape: bf16[3,9,64], index: 1, kind: input, shape index: {}]   ;;  %s3037_s2 = inlined_call_operand.vmem [shape: f32[1,64], index: 2, kind: input, shape index: {}]   ;;  %s3038_s3 = inlined_call_operand.vmem [shape: bf16[2,256,64], index: 3, kind: output, shape index: {0}]   ;;  %s3039_s4 = inlined_call_operand.vmem [shape: bf16[2,256,64], index: 4, kind: output, shape index: {1}]  }
   0x1   :  { %s2272_s17 = smov 0   ;;  %s2274_s18 = smov 0  }
   0x2   :  { %s2276_s19 = smov 0  }
   0x3 LB: > { %s24_s20 = sadd.s32 1, %s2225_s17  ;;  %s27_s21 = sadd.s32 1, %s2229_s18  ;;  %s2233_s19 = sphi %s2276_s19, %s15_s19   ;;  %s2229_s18 = sphi %s2274_s18, %s3077_s18   ;;  %s2225_s17 = sphi %s2272_s17, %s3076_s17   ;;  %s2221_s16 = sphi %s2270_s16, %s3075_s16   ;;  %s2217_s15 = sphi %s2268_s15, %s3074_s15  }
   0x4   : > { %p25_p0 = scmp.ge.s32.totalorder %s24_s20, 2  ;;  %p1970_p1 = scmp.ge.s32.totalorder %s2233_s19, 1 }
   0x5   : > { %p181_p2 = scmp.lt.s32.totalorder %s2233_s19, 5 }
   0x6   : > { %s3079_s20 = smov (%p25_p0, %s24_s20), 0  ;;  %s3081_s21 = smov (!%p25_p0, %s27_s21), %s2229_s18 }
   0x7   : > { %p182_p3 = pnand %p1970_p1, %p181_p2  ;;  %p29_p4 = scmp.ge.s32.totalorder %s3081_s21, 2 }
   0x8   : > { %p220_p5 = scmp.lt.s32.totalorder (!%p182_p3), %s2221_s16, 1  ;;  %s1980_s22 = sshll.u32 (!%p182_p3), %s2217_s15, 7  ;;  %v352_v0 = vlaneseq (!%p182_p3)  ;;  %vm2235_vm0 = vmmov (!%p182_p3), 1   ;;  %v2236_v2 = vmov (!%p182_p3), 0   ;;  %vm706_vm2 = vsmask.f32 (!%p182_p3), 7424 }
   0x9   : > { %s3083_s21 = smov (%p29_p4, %s3081_s21), 0  ;;  %185 = sbr.rel (%p182_p3) target bundleno = 526 (0x20e), region = 32 }
   0xa   : > { %s258_s23 = sshra.s32 (!%p182_p3), %s1980_s22, 3  ;;  %vm810_vm1 = vmpackc.low (!%p182_p3), %vm2235_vm0, %vm2235_vm0  ;;  %v2303_v1 = vshrl.u32 (!%p182_p3), %v352_v0, 7  ;;  %s1979_s26 = sshll.u32 (!%p182_p3), %s2217_s15, 3 }
   0xb   : > { %s1984_s24 = sshll.u32 (!%p182_p3), %s258_s23, 2  ;;  %v2306_v3 = vsel (!%p182_p3), %vm810_vm1, 65537, %v2236_v2  ;;  %s2334_s30 = sadd.s32 (!%p182_p3), 8, %s1979_s26 }
   0xc   : > { %v364_v4 = vadd.s32 (!%p182_p3), 88, %v2303_v1  ;;  %v356_v5 = vadd.s32 (!%p182_p3), 24, %v2303_v1  ;;  %v2312_v6 = vadd.s32 (!%p182_p3), 104, %v2303_v1  ;;  %v2315_v7 = vadd.s32 (!%p182_p3), 40, %v2303_v1  ;;  %p255_p6 = scmp.lt.s32.totalorder (!%p182_p3), %s2334_s30, 15  ;;  %s2237_s6 = smov (!%p182_p3), 3  }
   0xd   : > { %v2324_v8 = vadd.s32 (!%p182_p3), 120, %v2303_v1  ;;  %v2327_v9 = vadd.s32 (!%p182_p3), 56, %v2303_v1  ;;  %v2330_v10 = vadd.s32 (!%p182_p3), 72, %v2303_v1  ;;  %v2337_v11 = vadd.s32 (!%p182_p3), 152, %v2303_v1  ;;  %p296_p7 = scmp.lt.s32.totalorder (!%p182_p3), %s2334_s30, 16  ;;  %s1981_s10 = sadd.s32 (!%p182_p3), 4294967295, %s1979_s26 }
   0xe   : > { %v454_v12 = vand.u32 (!%p182_p3), 15, %v364_v4  ;;  %v398_v13 = vand.u32 (!%p182_p3), 15, %v356_v5  ;;  %v468_v14 = vand.u32 (!%p182_p3), 15, %v2312_v6  ;;  %v412_v15 = vand.u32 (!%p182_p3), 15, %v2315_v7  ;;  %p251_p8 = scmp.gt.s32.totalorder (!%p182_p3), %s1981_s10, 0  ;;  %s2238_s12 = smov (!%p182_p3), 6  }
   0xf   : > { %v482_v20 = vand.u32 (!%p182_p3), 15, %v2324_v8  ;;  %p290_p9 = scmp.gt.s32.totalorder (!%p182_p3), %s2217_s15, 0 }
  0x10   : > { %s3085_s16 = smov (!%p220_p5, %s2221_s16), 1  ;;  %vm2349_vm3 = vcmp.ne.s32.totalorder %v454_v12, 15  ;;  %vm902_vm5 = vcmp.ne.s32.totalorder %v398_v13, 15  ;;  %vm912_vm8 = vcmp.ne.s32.totalorder %v468_v14, 15  ;;  %vm904_vm10 = vcmp.ne.s32.totalorder %v412_v15, 15  ;;  %s3087_s10 = smov (!%p251_p8, %s1981_s10), 0 }
  0x11   : > { %s2072_s25 = sshll.u32 %s3085_s16, 7  ;;  %vm970_vm4 = vmpackc.low %vm2349_vm3, %vm2349_vm3  ;;  %vm914_vm13 = vcmp.ne.s32.totalorder %v482_v20, 15  ;;  %v426_v12 = vand.u32 15, %v2327_v9  ;;  %vm746_vm3 = vcmask 1047552   ;;  %s1982_s22 = sshll.u32 %s3087_s10, 4 }
  0x12   : > { %s2321_s29 = scalar_lea.vmem %s3035_s0, %s2072_s25  ;;  %v990_v38 = vsel %vm970_vm4, 65537, %v2236_v2  ;;  %vm962_vm7 = vmpackc.low %vm902_vm5, %vm902_vm5  ;;  %s2484_s23 = sshra.s32 %s1982_s22, 3 }
  0x13   : > { %s2340_s5 = scalar_lea.vmem %s2321_s29, %s1984_s24  ;;  %v2012_v40 = vcombine.low %v2306_v3, %v990_v38  ;;  %v982_v52 = vsel %vm962_vm7, 65537, %v2236_v2  ;;  %vm972_vm9 = vmpackc.low %vm912_vm8, %vm912_vm8  ;;  %vm906_vm1 = vcmp.ne.s32.totalorder %v426_v12, 15  ;;  %s1985_s24 = sshll.u32 %s2484_s23, 2 }
  0x14   : > { %v2187_v16 = vld [vmem:[%s2340_s5 + $0x8] sm:$0xff]   ;;  %v2347_v17 = vld [vmem:[%s2340_s5] sm:$0xff]   ;;  %v2370_v26 = vld [vmem:[%s2340_s5 + $0x30] sm:$0xff]   ;;  %s256_s7 = scalar_select %p255_p6, %s2334_s30, 15  ;;  %v2008_v55 = vcombine.low %v2306_v3, %v982_v52  ;;  %v992_v57 = vsel %vm972_vm9, 65537, %v2236_v2 }
  0x15   : > { %1053 = vrot.lane.b32.xlu1 %v2187_v16, %s2237_s6  ;;  %v630_v19 = vshrl.u32 %v2187_v16, 16  ;;  %v633_v21 = vshll.u32 %v2187_v16, 16  ;;  %1051 = vrot.lane.b32.xlu0 %v2347_v17, %s2237_s6  ;;  %v625_v22 = vshll.u32 %v2347_v17, 16  ;;  %v2362_v23 = vld [vmem:[%s2340_s5 + $0x28] sm:$0xff]   ;;  %v2365_v24 = vld [vmem:[%s2340_s5 + $0x20] sm:$0xff]   ;;  %v622_v27 = vshrl.u32 %v2347_v17, 16  ;;  %vm964_vm12 = vmpackc.low %vm904_vm10, %vm904_vm10  ;;  %s281_s25 = scalar_lea.vmem %s2321_s29, %s1985_s24 }
  0x16   : > { %v665_v28 = vshll.u32 %v2362_v23, 16  ;;  %v654_v29 = vshrl.u32 %v2365_v24, 16  ;;  %v657_v30 = vshll.u32 %v2365_v24, 16  ;;  %v662_v31 = vshrl.u32 %v2362_v23, 16  ;;  %v2387_v35 = vld [vmem:[%s2340_s5 + $0x10] sm:$0xff]   ;;  %v2413_v45 = vld [vmem:[%s2340_s5 + $0x38] sm:$0xff]   ;;  %vm974_vm15 = vmpackc.low %vm914_vm13, %vm914_vm13 }
  0x17   : > { %v2367_v25 = vrot.slane %v630_v19, 7  ;;  %v673_v32 = vshll.u32 %v2370_v26, 16  ;;  %v670_v34 = vshrl.u32 %v2370_v26, 16  ;;  %v2406_v41 = vrot.slane %v625_v22, 1  ;;  %s1983_s8 = sshll.u32 %s256_s7, 4  ;;  %v2448_v60 = vld [vmem:[%s2340_s5 + $0x18] sm:$0xff]   ;;  %vm966_vm4 = vmpackc.low %vm906_vm1, %vm906_vm1 }
  0x18   : > { %v2391_v36 = vrot.slane %v657_v30, 1  ;;  %v724_v37 = vrot.slane %v665_v28, 1  ;;  %v2401_v39 = vrot.slane %v662_v31, 7  ;;  %v712_v42 = vrot.slane %v633_v21, 1  ;;  %s284_s9 = sshra.s32 %s1983_s8, 3  ;;  %vm2550_vm1 = vmand %vm746_vm3, %vm706_vm2  ;;  %s1973_s22 = sshll.u32 %s2217_s15, 4 }
  0x19   : > { %1061 = vrot.lane.b32.xlu1 %v2362_v23, %s2237_s6  ;;  %v2381_v33 = vor.u32 %v633_v21, %v2367_v25  ;;  %1059 = vrot.lane.b32.xlu0 %v2365_v24, %s2237_s6  ;;  %v641_v43 = vshll.u32 %v2387_v35, 16  ;;  %vm2420_vm6 = vcmp.ne.s16.totalorder %v2012_v40, 0  ;;  %v711_v47 = vor.u32 %v2406_v41, %v622_v27  ;;  %s1986_s11 = sshll.u32 %s284_s9, 2  ;;  %p228_p10 = scmp.lt.s32.totalorder %s1973_s22, 31 }
  0x1a   : > { %v723_v44 = vor.u32 %v2391_v36, %v654_v29  ;;  %v726_v48 = vor.u32 %v724_v37, %v662_v31  ;;  %v727_v49 = vrot.slane %v673_v32, 1  ;;  %v638_v50 = vshrl.u32 %v2387_v35, 16  ;;  %s2456_s13 = scalar_lea.vmem %s2321_s29, %s1986_s11  ;;  %s1974_s23 = sshll.u32 %s3085_s16, 5 }
  0x1b   : > { %v713_v54 = vsel %vm706_vm2, %v711_v47, %v712_v42  ;;  %v714_v58 = vor.u32 %v712_v42, %v630_v19  ;;  %v715_v59 = vrot.slane %v641_v43, 1  ;;  %vm1030_vm11 = vcmp.ne.s16.totalorder %v2008_v55, 0  ;;  %s297_s14 = scalar_select %p296_p7, 1, 0  ;;  %v288_v9 = vld [vmem:[%s2456_s13] sm:$0xf] }
  0x1c   : > { %v725_v51 = vsel %vm706_vm2, %v723_v44, %v724_v37  ;;  %v728_v56 = vsel %vm706_vm2, %v726_v48, %v727_v49  ;;  %v2013_v61 = vcombine.low %v2306_v3, %v992_v57  ;;  %v681_v62 = vshll.u32 %v2413_v45, 16  ;;  %v289_v38 = vld [vmem:[%s2456_s13 + $0x4] sm:$0xf]  ;;  %s291_s26 = scalar_select %p290_p9, 1, 0 }
  0x1d   : > { %1063 = vrot.lane.b32.xlu1 %v2370_v26, %s2237_s6  ;;  %1055 = vrot.lane.b32.xlu0 %v2387_v35, %s2237_s6  ;;  %v1044_v53 = vsel %vm2420_vm6, %v725_v51, 0  ;;  %v729_v63 = vor.u32 %v727_v49, %v670_v34  ;;  %v1040_v0 = vsel %vm1030_vm11, %v713_v54, 0  ;;  %v716_v4 = vsel %vm706_vm2, %v714_v58, %v715_v59  ;;  %s2241_s13 = smov 9   ;;  %s3089_s22 = smov (!%p228_p10, %s1973_s22), 31 }
  0x1e   : > { %v984_v5 = vsel %vm964_vm12, 65537, %v2236_v2  ;;  %vm1035_vm14 = vcmp.ne.s16.totalorder %v2013_v61, 0  ;;  %v2466_v7 = vrot.slane %v681_v62, 1  ;;  %v994_v14 = vsel %vm974_vm15, 65537, %v2236_v2  ;;  %s231_s24 = sadd.s32 %s1974_s23, %s3089_s22 }
  0x1f   : > { %v2009_v6 = vcombine.low %v2306_v3, %v984_v5  ;;  %v1045_v13 = vsel %vm1035_vm14, %v728_v56, 0  ;;  %v649_v8 = vshll.u32 %v2448_v60, 16  ;;  %v717_v15 = vor.u32 %v715_v59, %v638_v50  ;;  %s1975_s27 = sshll.u32 %s231_s24, 2 }
  0x20   : > { %v731_v16 = vsel %vm706_vm2, %v729_v63, %v2466_v7  ;;  %v2014_v18 = vcombine.low %v2306_v3, %v994_v14  ;;  %v440_v21 = vand.u32 15, %v2330_v10  ;;  %v646_v31 = vshrl.u32 %v2448_v60, 16  ;;  %s2934_s30 = scalar_lea.vmem %s3038_s3, %s1975_s27  ;;  %s2942_s5 = scalar_lea.vmem %s3039_s4, %s1975_s27 }
  0x21   : > { %1089 = vrot.lane.b32.xlu1 %v1044_v53, %s2238_s12  ;;  %1081 = vrot.lane.b32.xlu0 %v1040_v0, %s2238_s12  ;;  %vm1031_vm0 = vcmp.ne.s16.totalorder %v2009_v6, 0  ;;  %v718_v20 = vrot.slane %v649_v8, 1  ;;  %v986_v37 = vsel %vm966_vm4, 65537, %v2236_v2  ;;  %v298_v40 = vstv %s297_s14  ;;  %s2242_s14 = smov 18  }
  0x22   : > { %v1041_v19 = vsel %vm1031_vm0, %v716_v4, 0  ;;  %vm1036_vm5 = vcmp.ne.s16.totalorder %v2014_v18, 0  ;;  %v510_v42 = vand.u32 15, %v2337_v11  ;;  %vm613_vm6 = vsmask.f32 256 }
  0x23   : > { %v1046_v44 = vsel %vm1036_vm5, %v731_v16, 0  ;;  %v719_v46 = vsel %vm706_vm2, %v717_v15, %v718_v20  ;;  %v2010_v10 = vcombine.low %v2306_v3, %v986_v37  ;;  %v720_v47 = vor.u32 %v718_v20, %v646_v31  ;;  %v283_v18 = vld [vmem:[%s281_s25 + $0x4] sm:$0xf] }
  0x24   : > { %vm908_vm7 = vcmp.ne.s32.totalorder %v440_v21, 15  ;;  %vm299_vm8 = vcmp.eq.s32.totalorder %v298_v40, 1  ;;  %vm2497_vm9 = vcmp.ne.s32.totalorder %v510_v42, 15  ;;  %v370_v11 = vadd.s32 136, %v2303_v1 }
  0x25   : > { %1091 = vrot.lane.b32.xlu1 %v1045_v13, %s2238_s12  ;;  %1083 = vrot.lane.b32.xlu0 %v1041_v19, %s2238_s12  ;;  %vm1032_vm10 = vcmp.ne.s16.totalorder %v2010_v10, 0  ;;  %v722_v49 = vsel %vm706_vm2, %v720_v47, %v2391_v36  ;;  %vm968_vm11 = vmpackc.low %vm908_vm7, %vm908_vm7  ;;  %v300_v51 = vsel %vm299_vm8, %v288_v9, 0  ;;  %v301_v52 = vsel %vm299_vm8, %v289_v38, 0  ;;  %v282_v13 = vld [vmem:[%s281_s25] sm:$0xf] }
  0x26   : > { %v1042_v53 = vsel %vm1032_vm10, %v719_v46, 0  ;;  %v988_v54 = vsel %vm968_vm11, 65537, %v2236_v2  ;;  %v2505_v55 = vcombine.low %v300_v51, %v301_v52  ;;  %vm978_vm12 = vmpackc.low %vm2497_vm9, %vm2497_vm9  ;;  %v496_v56 = vand.u32 15, %v370_v11 }
  0x27   : > { %v2011_v57 = vcombine.low %v2306_v3, %v988_v54  ;;  %v998_v36 = vsel %vm978_vm12, 65537, %v2236_v2  ;;  %v678_v58 = vshrl.u32 %v2413_v45, 16  ;;  %v357_v59 = vadd.s32 32, %v2303_v1 }
  0x28   : > { %v689_v61 = vshll.u32 %v2505_v55, 16  ;;  %v686_v63 = vshrl.u32 %v2505_v55, 16  ;;  %v2016_v0 = vcombine.low %v2306_v3, %v998_v36  ;;  %vm916_vm13 = vcmp.ne.s32.totalorder %v496_v56, 15 }
  0x29   : > { %1093 = vrot.lane.b32.xlu1 %v1046_v44, %s2238_s12  ;;  %1085 = vrot.lane.b32.xlu0 %v1042_v53, %s2238_s12  ;;  %v2525_v4 = vrot.slane %v670_v34, 7  ;;  %vm2527_vm14 = vcmp.ne.s16.totalorder %v2011_v57, 0  ;;  %v732_v6 = vor.u32 %v2466_v7, %v678_v58  ;;  %vm976_vm15 = vmpackc.low %vm916_vm13, %vm916_vm13  ;;  %v405_v12 = vand.u32 15, %v357_v59 }
  0x2a   : > { %v2536_v14 = vrot.slane %v638_v50, 7  ;;  %v1043_v15 = vsel %vm2527_vm14, %v722_v49, 0  ;;  %v733_v34 = vrot.slane %v689_v61, 1  ;;  %vm2542_vm0 = vcmp.ne.s16.totalorder %v2016_v0, 0 }
  0x2b   : > { %v996_v50 = vsel %vm976_vm15, 65537, %v2236_v2  ;;  %vm753_vm4 = vcmp.ne.s32.totalorder %v405_v12, 0  ;;  %v624_v9 = vrot.slane %v622_v27, 7  ;;  %v292_v19 = vstv %s291_s26 }
  0x2c   : > { %v735_v20 = vor.u32 %v733_v34, %v686_v63  ;;  %v734_v21 = vsel %vm706_vm2, %v732_v6, %v733_v34  ;;  %v2015_v37 = vcombine.low %v2306_v3, %v996_v50  ;;  %vm813_vm3 = vmpackc.low %vm753_vm4, %vm753_vm4  ;;  %vm293_vm5 = vcmp.eq.s32.totalorder %v292_v19, 1 }
  0x2d   : > { %1065 = vrot.lane.b32.xlu1 %v2413_v45, %s2237_s6  ;;  %1057 = vrot.lane.b32.xlu0 %v2448_v60, %s2237_s6  ;;  %v833_v38 = vsel %vm813_vm3, 65537, %v2236_v2  ;;  %v2565_v40 = vsel %vm613_vm6, %v624_v9, %v2381_v33  ;;  %v294_v42 = vsel %vm293_vm5, %v282_v13, 0  ;;  %v295_v27 = vsel %vm293_vm5, %v283_v18, 0 }
  0x2e   : > { %v748_v44 = vsel %vm2550_vm1, %v735_v20, 0  ;;  %vm2569_vm7 = vcmp.ne.s16.totalorder %v2015_v37, 0  ;;  %v1999_v10 = vcombine.low %v833_v38, %v2306_v3  ;;  %v2574_v47 = vcombine.low %v294_v42, %v295_v27 }
  0x2f   : > { %v1048_v33 = vsel %vm2542_vm0, %v748_v44, 0  ;;  %v1047_v48 = vsel %vm2569_vm7, %v734_v21, 0  ;;  %v355_v11 = vadd.s32 16, %v2303_v1  ;;  %v627_v49 = vor.u32 %v625_v22, %v624_v9 }
  0x30   : > { %vm2586_vm8 = vcmp.ne.s16.totalorder %v1999_v10, 0  ;;  %v615_v52 = vshrl.u32 %v2574_v47, 16  ;;  %v365_v53 = vadd.s32 96, %v2303_v1  ;;  %v656_v54 = vrot.slane %v654_v29, 7 }
  0x31   : > { %1087 = vrot.lane.b32.xlu1 %v1043_v15, %s2238_s12  ;;  %1067 = vrot.lane.b32.xlu0 %v2505_v55, %s2237_s6  ;;  %v891_v56 = vsel %vm2586_vm8, %v2565_v40, 0  ;;  %v391_v57 = vand.u32 15, %v355_v11  ;;  %v667_v17 = vor.u32 %v665_v28, %v2401_v39  ;;  %v363_v22 = vadd.s32 80, %v2303_v1 }
  0x32   : > { %v2603_v36 = vrot.slane %v615_v52, 7  ;;  %v461_v59 = vand.u32 15, %v365_v53  ;;  %v648_v0 = vrot.slane %v646_v31, 7  ;;  %v659_v29 = vor.u32 %v657_v30, %v656_v54 }
  0x33   : > { %vm751_vm9 = vcmp.ne.s32.totalorder %v391_v57, 0  ;;  %v2611_v5 = vsel %vm613_vm6, %v656_v54, %v667_v17  ;;  %v447_v23 = vand.u32 15, %v363_v22  ;;  %v367_v28 = vadd.s32 112, %v2303_v1 }
  0x34   : > { %vm811_vm10 = vmpackc.low %vm751_vm9, %vm751_vm9  ;;  %v2616_v6 = vsel %vm613_vm6, %v2603_v36, %v627_v49  ;;  %vm761_vm11 = vcmp.ne.s32.totalorder %v461_v59, 0  ;;  %v2619_v31 = vsel %vm613_vm6, %v648_v0, %v659_v29  ;;  %v675_v24 = vor.u32 %v673_v32, %v2525_v4 }
  0x35   : > { %1097 = vrot.lane.b32.xlu1 %v1048_v33, %s2238_s12  ;;  %1095 = vrot.lane.b32.xlu0 %v1047_v48, %s2238_s12  ;;  %v831_v30 = vsel %vm811_vm10, 65537, %v2236_v2  ;;  %vm821_vm12 = vmpackc.low %vm761_vm11, %vm761_vm11  ;;  %vm759_vm13 = vcmp.ne.s32.totalorder %v447_v23, 0  ;;  %v475_v12 = vand.u32 15, %v367_v28  ;;  %v359_v13 = vadd.s32 48, %v2303_v1 }
  0x36   : > { %v1998_v15 = vcombine.low %v831_v30, %v2306_v3  ;;  %v841_v34 = vsel %vm821_vm12, 65537, %v2236_v2  ;;  %vm819_vm14 = vmpackc.low %vm759_vm13, %vm759_vm13  ;;  %v2630_v16 = vsel %vm613_vm6, %v2401_v39, %v675_v24  ;;  %v643_v26 = vor.u32 %v641_v43, %v2536_v14  ;;  %v2022_v30 = vld.sshfl [vmem:[%s3036_s1 + $0x14] sm:$0x1 pattern:$0x75316420] }
  0x37   : > { %v2003_v32 = vcombine.low %v841_v34, %v2306_v3  ;;  %v839_v18 = vsel %vm819_vm14, 65537, %v2236_v2  ;;  %vm763_vm15 = vcmp.ne.s32.totalorder %v475_v12, 0  ;;  %v419_v7 = vand.u32 15, %v359_v13 }
  0x38   : > { %v680_v50 = vrot.slane %v678_v58, 7  ;;  %vm2641_vm0 = vcmp.ne.s16.totalorder %v1998_v15, 0  ;;  %v2002_v39 = vcombine.low %v839_v18, %v2306_v3  ;;  %vm823_vm1 = vmpackc.low %vm763_vm15, %vm763_vm15  ;;  %v2648_v35 = vsel %vm613_vm6, %v2367_v25, %v643_v26 }
  0x39   : > { %1049 = vrot.lane.b32.xlu0 %v2574_v47, %s2237_s6  ;;  %v890_v43 = vsel %vm2641_vm0, %v2616_v6, 0  ;;  %vm2653_vm4 = vcmp.ne.s16.totalorder %v2003_v32, 0  ;;  %v843_v58 = vsel %vm823_vm1, 65537, %v2236_v2  ;;  %vm755_vm3 = vcmp.ne.s32.totalorder %v419_v7, 0 }
  0x3a   : > { %v688_v20 = vrot.slane %v686_v63, 7  ;;  %v895_v21 = vsel %vm2653_vm4, %v2611_v5, 0  ;;  %vm2663_vm5 = vcmp.ne.s16.totalorder %v2002_v39, 0  ;;  %v2004_v37 = vcombine.low %v843_v58, %v2306_v3  ;;  %vm815_vm7 = vmpackc.low %vm755_vm3, %vm755_vm3 }
  0x3b   : > { %v894_v38 = vsel %vm2663_vm5, %v2619_v31, 0  ;;  %v835_v42 = vsel %vm815_vm7, 65537, %v2236_v2  ;;  %v354_v27 = vadd.s32 8, %v2303_v1  ;;  %v618_v63 = vshll.u32 %v2574_v47, 16 }
  0x3c   : > { %vm2674_vm9 = vcmp.ne.s16.totalorder %v2004_v37, 0  ;;  %v2000_v46 = vcombine.low %v835_v42, %v2306_v3  ;;  %v369_v10 = vadd.s32 128, %v2303_v1  ;;  %v683_v33 = vor.u32 %v681_v62, %v680_v50 }
  0x3d   : > { %v896_v48 = vsel %vm2674_vm9, %v2630_v16, 0  ;;  %v384_v11 = vand.u32 15, %v354_v27  ;;  %v707_v49 = vrot.slane %v618_v63, 1  ;;  %v361_v53 = vadd.s32 64, %v2303_v1 }
  0x3e   : > { %vm2686_vm10 = vcmp.ne.s16.totalorder %v2000_v46, 0  ;;  %v489_v57 = vand.u32 15, %v369_v10  ;;  %v2692_v17 = vsel %vm613_vm6, %v2525_v4, %v683_v33  ;;  %v651_v45 = vor.u32 %v649_v8, %v648_v0 }
  0x3f   : > { %v892_v62 = vsel %vm2686_vm10, %v2648_v35, 0  ;;  %v708_v22 = vor.u32 %v707_v49, %v615_v52  ;;  %vm900_vm11 = vcmp.ne.s32.totalorder %v384_v11, 15  ;;  %v433_v59 = vand.u32 15, %v361_v53 }
  0x40   : > { %vm960_vm12 = vmpackc.low %vm900_vm11, %vm900_vm11  ;;  %vm765_vm13 = vcmp.ne.s32.totalorder %v489_v57, 0  ;;  %v2703_v29 = vsel %vm613_vm6, %v2536_v14, %v651_v45  ;;  %v371_v4 = vadd.s32 144, %v2303_v1  ;;  %v691_v60 = vor.u32 %v689_v61, %v688_v20  ;;  %v2017_v53 = vld.sshfl [vmem:[%s3036_s1] sm:$0x33 pattern:$0x75316420] }
  0x41   : > { %v710_v8 = vsel %vm706_vm2, %v708_v22, %v2406_v41  ;;  %v980_v0 = vsel %vm960_vm12, 65537, %v2236_v2  ;;  %vm825_vm14 = vmpackc.low %vm765_vm13, %vm765_vm13  ;;  %vm757_vm15 = vcmp.ne.s32.totalorder %v433_v59, 0  ;;  %v377_v47 = vand.u32 15, %v2303_v1 }
  0x42   : > { %v2007_v52 = vcombine.low %v2306_v3, %v980_v0  ;;  %v845_v23 = vsel %vm825_vm14, 65537, %v2236_v2  ;;  %vm817_vm1 = vmpackc.low %vm757_vm15, %vm757_vm15  ;;  %v503_v14 = vand.u32 15, %v371_v4  ;;  %v2715_v28 = vsel %vm613_vm6, %v680_v50, %v691_v60  ;;  %v2020_v0 = vld.sshfl [vmem:[%s3036_s1 + $0xc] sm:$0x1 pattern:$0x75316420] }
  0x43   : > { %v2005_v55 = vcombine.low %v845_v23, %v2306_v3  ;;  %v837_v61 = vsel %vm817_vm1, 65537, %v2236_v2  ;;  %v620_v41 = vor.u32 %v618_v63, %v2603_v36  ;;  %vm703_vm2 = vcmask 1040384  }
  0x44   : > { %vm1029_vm3 = vcmp.ne.s16.totalorder %v2007_v52, 0  ;;  %v2001_v24 = vcombine.low %v837_v61, %v2306_v3  ;;  %vm767_vm7 = vcmp.ne.s32.totalorder %v503_v14, 0  ;;  %vm2722_vm11 = vmand %vm703_vm2, %vm613_vm6  ;;  %vm749_vm12 = vcmp.ne.s32.totalorder %v377_v47, 0 }
  0x45   : > { %v1039_v12 = vsel %vm1029_vm3, %v710_v8, 0  ;;  %vm2726_vm13 = vcmp.ne.s16.totalorder %v2005_v55, 0  ;;  %vm827_vm14 = vmpackc.low %vm767_vm7, %vm767_vm7  ;;  %v705_v7 = vsel %vm2722_vm11, 0, %v620_v41  ;;  %v2239_v37 = vmov 1966171168  }
  0x46   : > { %1079 = vrot.lane.b32.xlu1 %v1039_v12, %s2238_s12  ;;  %v897_v36 = vsel %vm2726_vm13, %v2692_v17, 0  ;;  %vm2734_vm15 = vcmp.ne.s16.totalorder %v2001_v24, 0  ;;  %v847_v34 = vsel %vm827_vm14, 65537, %v2236_v2  ;;  %vm809_vm6 = vmpackc.low %vm749_vm12, %vm749_vm12  ;;  %v1285_v42 = vunpack.c.l.s4 %v2239_v37 }
  0x47   : > { %v893_v26 = vsel %vm2734_vm15, %v2703_v29, 0  ;;  %v2006_v32 = vcombine.low %v847_v34, %v2306_v3  ;;  %v829_v18 = vsel %vm809_vm6, 65537, %v2236_v2  ;;  %v1283_v57 = vcombine.high %v2017_v53, %v2017_v53  ;;  %v2021_v55 = vld.sshfl [vmem:[%s3036_s1 + $0x10] sm:$0x33 pattern:$0x75316420] }
  0x48   : > { %v1997_v50 = vcombine.low %v829_v18, %v2306_v3  ;;  %v1286_v27 = vunpack.c.0.s8 %v1285_v42  ;;  %v2019_v3 = vld.sshfl [vmem:[%s3036_s1 + $0x8] sm:$0x33 pattern:$0x75316420]  ;;  %vm1099_vm3 = vcmask 23552   ;;  %vm1130_vm7 = vcmask 48128  }
  0x49   : > { %vm2747_vm1 = vcmp.ne.s16.totalorder %v2006_v32, 0  ;;  %v1321_v63 = vcombine.high %v2019_v3, %v2019_v3  ;;  %v1359_v32 = vcombine.high %v2021_v55, %v2021_v55  ;;  %vm1161_vm11 = vcmask 72704  }
  0x4a   : > { %v898_v58 = vsel %vm2747_vm1, %v2715_v28, 0  ;;  %vm879_vm2 = vcmp.ne.s16.totalorder %v1997_v50, 0  ;;  %v2757_v2 = vsub.s32 %v1286_v27, %v2303_v1  ;;  %v2018_v1 = vld.sshfl [vmem:[%s3036_s1 + $0x4] sm:$0x1 pattern:$0x75316420] }
  0x4b   : > { %v2754_v20 = vsel %vm879_vm2, %v705_v7, 0  ;;  %vm1545_vm0 = vcmask 1044480   ;;  %vm1546_vm4 = vcmask 1045504   ;;  %vm1247_vm8 = vcmask 146432  }
  0x4c   : > { %v1328_v46 = vrot.slane %v2019_v3, %v2757_v2  ;;  %v1335_v11 = vrot.slane %v1321_v63, %v2757_v2  ;;  %v1313_v60 = vrot.slane %v2018_v1, %v2757_v2  ;;  %v1290_v52 = vrot.slane %v2017_v53, %v2757_v2 }
  0x4d   : > { %v1297_v23 = vrot.slane %v1283_v57, %v2757_v2  ;;  %v1366_v37 = vrot.slane %v2021_v55, %v2757_v2  ;;  %v1389_v42 = vrot.slane %v2022_v30, %v2757_v2  ;;  %vm1528_vm5 = vcmask 220160  }
  0x4e   : > { %v1336_v49 = vcombine.high %v1328_v46, %v1328_v46  ;;  %v1337_v45 = vcombine.high %v1335_v11, %v1335_v11  ;;  %v1400_v22 = vunpack.i.h.s16 %v1328_v46  ;;  %v1402_v59 = vunpack.i.h.s16 %v1335_v11 }
  0x4f   : > { %v2024_v61 = vpack.i.b16 %v1328_v46, %v1313_v60  ;;  %v1438_v12 = vcombine.low %v1290_v52, %v1297_v23  ;;  %v2029_v34 = vcombine.high %v1290_v52, %v1297_v23  ;;  %v1351_v46 = vrot.slane %v2020_v0, %v2757_v2 }
  0x50   : > { %v1404_v8 = vunpack.i.h.s16 %v1336_v49  ;;  %v2025_v14 = vpack.i.b16 %v1335_v11, %v1400_v22  ;;  %v2026_v41 = vpack.i.b16 %v1336_v49, %v1402_v59  ;;  %v1373_v11 = vrot.slane %v1359_v32, %v2757_v2 }
  0x51   : > { %v1448_v3 = vrot.slane %v1438_v12, %v2757_v2  ;;  %v1455_v63 = vrot.slane %v2029_v34, %v2757_v2  ;;  %v1374_v1 = vcombine.high %v1366_v37, %v1366_v37  ;;  %v1406_v59 = vunpack.i.h.s16 %v1337_v45 }
  0x52   : > { %v2027_v24 = vpack.i.b16 %v1337_v45, %v1404_v8  ;;  %v1440_v7 = vcombine.low %v2024_v61, %v2025_v14  ;;  %v1375_v22 = vcombine.high %v1373_v11, %v1373_v11  ;;  %v1416_v60 = vunpack.i.l.s16 %v1389_v42 }
  0x53   : > { %v1470_v57 = vcombine.low %v1448_v3, %v1455_v63  ;;  %v1488_v23 = vcombine.low %v1373_v11, %v1374_v1  ;;  %v2028_v61 = vpack.i.b16 %v1351_v46, %v1406_v59  ;;  %v2240_v32 = vmov 65535  }
  0x54   : > { %v1441_v50 = vcombine.low %v2026_v41, %v2027_v24  ;;  %v1462_v49 = vrot.slane %v1440_v7, %v2757_v2  ;;  %v1489_v41 = vcombine.low %v1375_v22, %v1416_v60  ;;  %v1547_v7 = vsel %vm1545_vm0, 4294967295, %v2240_v32 }
  0x55   : > { %v1478_v55 = vrot.slane %v1470_v57, %v2757_v2  ;;  %v1503_v24 = vrot.slane %v1488_v23, %v2757_v2  ;;  %v1548_v44 = vsel %vm1546_vm4, %v1547_v7, 0  ;;  %vm1713_vm9 = vcmask 519168  }
  0x56   : > { %v1469_v53 = vrot.slane %v1441_v50, %v2757_v2  ;;  %v1510_v30 = vrot.slane %v1489_v41, %v2757_v2 }
  0x58   : > { %v1471_v0 = vcombine.low %v1462_v49, %v1469_v53 }
  0x5a   : > { %v1485_v25 = vrot.slane %v1471_v0, %v2757_v2 }
  0x87   : > { %v2763_v10 = vpop.permute.xlu1 %1053  ;;  %v1052_v33 = vpop.permute.xlu0 %1051 }
  0x88   : > { %v1105_v45 = vsel %vm1099_vm3, %v890_v43, %v1052_v33  ;;  %v1486_v43 = vcombine.low %v1478_v55, %v1485_v25  ;;  %v1108_v19 = vsel %vm1099_vm3, %v891_v56, %v2763_v10 }
  0x8a   : > { %2115 = vmatprep.subr.bf16.mxu0 %v1486_v43  ;;  %2135 = vmatprep.subr.bf16.mxu1 %v1486_v43 }
  0x8b   : > { %v1062_v4 = vpop.permute.xlu1 %1061  ;;  %v1060_v47 = vpop.permute.xlu0 %1059  ;;  %2116 = vmatpush3.bf16.msra.mxu0 %v1486_v43  ;;  %2137 = vmatpush3.bf16.msra.mxu1 %v1486_v43 }
  0x8c   : > { %v1117_v8 = vsel %vm1099_vm3, %v894_v38, %v1060_v47  ;;  %v1487_v47 = vcombine.low %v2028_v61, %v1366_v37  ;;  %v1120_v6 = vsel %vm1099_vm3, %v895_v21, %v1062_v4  ;;  %v1525_v21 = vrot.slane %v1510_v30, %v2757_v2 }
  0x8e   : > { %v1496_v12 = vrot.slane %v1487_v47, %v2757_v2 }
  0x8f   : > { %v1064_v18 = vpop.permute.xlu1 %1063  ;;  %v1056_v27 = vpop.permute.xlu0 %1055 }
  0x90   : > { %v1511_v34 = vcombine.low %v1496_v12, %v1503_v24  ;;  %v1123_v40 = vsel %vm1099_vm3, %v896_v48, %v1064_v18  ;;  %v1111_v16 = vsel %vm1099_vm3, %v892_v62, %v1056_v27 }
  0x92   : > { %v1518_v50 = vrot.slane %v1511_v34, %v2757_v2 }
  0x93   : > { %v1090_v52 = vpop.permute.xlu1 %1089  ;;  %v1082_v31 = vpop.permute.xlu0 %1081 }
  0x94   : > { %v1147_v14 = vsel %vm1130_vm7, %v1117_v8, %v1090_v52  ;;  %v1135_v38 = vsel %vm1130_vm7, %v1105_v45, %v1082_v31  ;;  %v1526_v37 = vcombine.low %v1518_v50, %v1525_v21  ;;  %v2928_v50 = vld [vmem:[%s3037_s2] ss:$0 sm:$0xff] }
  0x95   : > { %1167 = vst.msk [vmem:[#allocation2 + $0x28] sm:$0xff] %vm1161_vm11, %v1147_v14  ;;  %1163 = vst.msk [vmem:[#allocation2 + $0x8] sm:$0xff] %vm1161_vm11, %v1135_v38 }
  0x96   : > { %v1550_v63 = vand.u32 %v1548_v44, %v1526_v37 }
  0x97   : > { %v1092_v9 = vpop.permute.xlu1 %1091  ;;  %v1084_v5 = vpop.permute.xlu0 %1083 }
  0x98   : > { %v1150_v33 = vsel %vm1130_vm7, %v1120_v6, %v1092_v9  ;;  %v1138_v4 = vsel %vm1130_vm7, %v1108_v19, %v1084_v5  ;;  %2117 = vmatprep.subr.bf16.mxu0 %v1550_v63  ;;  %2136 = vmatprep.subr.bf16.mxu1 %v1550_v63 }
  0x99   : > { %1168 = vst.msk [vmem:[#allocation2 + $0x30] sm:$0xff] %vm1161_vm11, %v1150_v33  ;;  %1164 = vst.msk [vmem:[#allocation2 + $0x10] sm:$0xff] %vm1161_vm11, %v1138_v4  ;;  %2118 = vmatpush3.bf16.msra.mxu0 %v1550_v63  ;;  %2138 = vmatpush3.bf16.msra.mxu1 %v1550_v63 }
  0x9b   : > { %v1094_v51 = vpop.permute.xlu1 %1093  ;;  %v1086_v48 = vpop.permute.xlu0 %1085 }
  0x9c   : > { %v1153_v56 = vsel %vm1130_vm7, %v1123_v40, %v1094_v51  ;;  %v2833_v10 = vld [vmem:[#allocation2 + $0x28] sm:$0xff]  ;;  %v1141_v42 = vsel %vm1130_vm7, %v1111_v16, %v1086_v48 }
  0x9d   : > { %1169 = vst.msk [vmem:[#allocation2 + $0x38] sm:$0xff] %vm1161_vm11, %v1153_v56  ;;  %1198 = vrot.lane.b32.xlu1 %v2833_v10, %s2241_s13  ;;  %v2844_v18 = vld [vmem:[#allocation2 + $0x8] sm:$0xff]  ;;  %1165 = vst.msk [vmem:[#allocation2 + $0x18] sm:$0xff] %vm1161_vm11, %v1141_v42 }
  0x9e   : > { %1190 = vrot.lane.b32.xlu0 %v2844_v18, %s2241_s13 }
  0x9f   : > { %v1066_v2 = vpop.permute.xlu1 %1065  ;;  %v1058_v35 = vpop.permute.xlu0 %1057 }
  0xa0   : > { %v2850_v3 = vld [vmem:[#allocation2 + $0x30] sm:$0xff]  ;;  %v1114_v62 = vsel %vm1099_vm3, %v893_v26, %v1058_v35  ;;  %v1126_v39 = vsel %vm1099_vm3, %v897_v36, %v1066_v2 }
  0xa1   : > { %1200 = vrot.lane.b32.xlu1 %v2850_v3, %s2241_s13  ;;  %v2854_v54 = vld [vmem:[#allocation2 + $0x10] sm:$0xff] }
  0xa2   : > { %1192 = vrot.lane.b32.xlu0 %v2854_v54, %s2241_s13 }
  0xa3   : > { %v1088_v27 = vpop.permute.xlu1 %1087  ;;  %v1068_v11 = vpop.permute.xlu0 %1067 }
  0xa4   : > { %v1144_v46 = vsel %vm1130_vm7, %v1114_v62, %v1088_v27  ;;  %v1129_v29 = vsel %vm1099_vm3, %v898_v58, %v1068_v11  ;;  %v2873_v49 = vld [vmem:[#allocation2 + $0x38] sm:$0xff] }
  0xa5   : > { %1166 = vst.msk [vmem:[#allocation2 + $0x20] sm:$0xff] %vm1161_vm11, %v1144_v46  ;;  %1215 = vrot.lane.b32.xlu1 %v2850_v3, %s2242_s14  ;;  %v1175_v53 = vld [vmem:[#allocation2 + $0x18] sm:$0xff] }
  0xa6   : > { %1207 = vrot.lane.b32.xlu0 %v2854_v54, %s2242_s14 }
  0xa7   : > { %v1098_v15 = vpop.permute.xlu1 %1097  ;;  %v1096_v28 = vpop.permute.xlu0 %1095 }
  0xa8   : > { %v1159_v26 = vsel %vm1130_vm7, %v1129_v29, %v1098_v15  ;;  %v1156_v58 = vsel %vm1130_vm7, %v1126_v39, %v1096_v28 }
  0xa9   : > { %1171 = vst.msk [vmem:[#allocation2 + $0x48] sm:$0xff] %vm1161_vm11, %v1159_v26  ;;  %1217 = vrot.lane.b32.xlu1 %v2873_v49, %s2242_s14  ;;  %1170 = vst.msk [vmem:[#allocation2 + $0x40] sm:$0xff] %vm1161_vm11, %v1156_v58 }
  0xaa   : > { %1209 = vrot.lane.b32.xlu0 %v1175_v53, %s2242_s14 }
  0xab   : > { %v1050_v17 = vpop.permute.xlu0 %1049 }
  0xac   : > { %v1176_v1 = vld [vmem:[#allocation2 + $0x20] sm:$0xff]  ;;  %v1102_v36 = vsel %vm1099_vm3, %v2754_v20, %v1050_v17 }
  0xad   : > { %1202 = vrot.lane.b32.xlu1 %v2873_v49, %s2241_s13 }
  0xae   : > { %1194 = vrot.lane.b32.xlu0 %v1175_v53, %s2241_s13 }
  0xb0   : > { %v1180_v57 = vld [vmem:[#allocation2 + $0x40] sm:$0xff]  ;;  %v1181_v13 = vld [vmem:[#allocation2 + $0x48] sm:$0xff] }
  0xb1   : > { %1204 = vrot.lane.b32.xlu1 %v1180_v57, %s2241_s13 }
  0xb2   : > { %1196 = vrot.lane.b32.xlu0 %v1176_v1, %s2241_s13 }
  0xb5   : > { %1219 = vrot.lane.b32.xlu1 %v1180_v57, %s2242_s14 }
  0xb6   : > { %1211 = vrot.lane.b32.xlu0 %v1176_v1, %s2242_s14 }
  0xb8   : > { %v1080_v22 = vpop.permute.xlu1 %1079 }
  0xb9   : > { %1221 = vrot.lane.b32.xlu1 %v1181_v13, %s2242_s14  ;;  %v1132_v59 = vsel %vm1130_vm7, %v1102_v36, %v1080_v22 }
  0xba   : > { %1213 = vrot.lane.b32.xlu0 %v2833_v10, %s2242_s14  ;;  %1162 = vst.msk [vmem:[#allocation2] sm:$0xff] %vm1161_vm11, %v1132_v59 }
  0xc1   : > { %v1172_v23 = vld [vmem:[#allocation2] sm:$0xff] }
 0x10f   : > { %v1199_v60 = vpop.permute.xlu1 %1198 }
 0x110   : > { %v1191_v8 = vpop.permute.xlu0 %1190  ;;  %v1237_v14 = vsel %vm1161_vm11, %v1176_v1, %v1199_v60 }
 0x111   : > { %v1225_v20 = vsel %vm1161_vm11, %v1172_v23, %v1191_v8 }
 0x113   : > { %v1201_v52 = vpop.permute.xlu1 %1200 }
 0x114   : > { %v1193_v0 = vpop.permute.xlu0 %1192  ;;  %v1240_v31 = vsel %vm1161_vm11, %v2833_v10, %v1201_v52 }
 0x115   : > { %v1228_v47 = vsel %vm1161_vm11, %v2844_v18, %v1193_v0 }
 0x117   : > { %v1216_v55 = vpop.permute.xlu1 %1215 }
 0x118   : > { %v1257_v61 = vsel %vm1247_vm8, %v1237_v14, %v1216_v55  ;;  %v1208_v41 = vpop.permute.xlu0 %1207 }
 0x119   : > { %2127 = vmatprep.mubr.msk.bf16.mxu1 %vm1528_vm5, %v1257_v61  ;;  %v1249_v45 = vsel %vm1247_vm8, %v1225_v20, %v1208_v41 }
 0x11a   : > { %2119 = vmatprep.mubr.msk.bf16.mxu0 %vm1528_vm5, %v1249_v45 }
 0x11b   : > { %v1218_v25 = vpop.permute.xlu1 %1217 }
 0x11c   : > { %v1259_v38 = vsel %vm1247_vm8, %v1240_v31, %v1218_v25  ;;  %v1210_v24 = vpop.permute.xlu0 %1209 }
 0x11d   : > { %2128 = vmatmul.mubr.msk.bf16.vlgmr.msra.gmra.mrb[0].mxu1 %vm1528_vm5, %v1259_v38  ;;  %v1251_v30 = vsel %vm1247_vm8, %v1228_v47, %v1210_v24 }
 0x11e   : > { %2120 = vmatmul.mubr.msk.bf16.vlgmr.msra.gmra.mrb[0].mxu0 %vm1528_vm5, %v1251_v30 }
 0x11f   : > { %v1203_v6 = vpop.permute.xlu1 %1202 }
 0x120   : > { %v1195_v9 = vpop.permute.xlu0 %1194  ;;  %v1243_v5 = vsel %vm1161_vm11, %v2850_v3, %v1203_v6 }
 0x121   : > { %v1231_v12 = vsel %vm1161_vm11, %v2854_v54, %v1195_v9 }
 0x123   : > { %v1205_v33 = vpop.permute.xlu1 %1204 }
 0x124   : > { %v1197_v43 = vpop.permute.xlu0 %1196  ;;  %v1246_v40 = vsel %vm1161_vm11, %v2873_v49, %v1205_v33 }
 0x125   : > { %v1234_v32 = vsel %vm1161_vm11, %v1175_v53, %v1197_v43 }
 0x127   : > { %v1220_v21 = vpop.permute.xlu1 %1219 }
 0x128   : > { %v1212_v19 = vpop.permute.xlu0 %1211  ;;  %v1261_v34 = vsel %vm1247_vm8, %v1243_v5, %v1220_v21 }
 0x129   : > { %v1253_v4 = vsel %vm1247_vm8, %v1231_v12, %v1212_v19  ;;  %2131 = vmatprep.mubr.msk.bf16.mxu1 %vm1528_vm5, %v1261_v34 }
 0x12a   : > { %2123 = vmatprep.mubr.msk.bf16.mxu0 %vm1528_vm5, %v1253_v4 }
 0x12b   : > { %v1222_v51 = vpop.permute.xlu1 %1221 }
 0x12c   : > { %v1214_v7 = vpop.permute.xlu0 %1213  ;;  %v1263_v10 = vsel %vm1247_vm8, %v1246_v40, %v1222_v51 }
 0x12d   : > { %v1255_v56 = vsel %vm1247_vm8, %v1234_v32, %v1214_v7  ;;  %2132 = vmatmul.mubr.msk.bf16.gmra.mrb[4].mxu1 %vm1528_vm5, %v1263_v10 }
 0x12e   : > { %2124 = vmatmul.mubr.msk.bf16.gmra.mrb[4].mxu0 %vm1528_vm5, %v1255_v56 }
 0x1f0   : > { %v2129_v44 = vpop.f32.mrb[0].mxu1 }
 0x1f1   : > { %v1627_v16 = vadd.f32 %v2129_v44, %v2928_v50  ;;  %v1618_v48 = vpop.f32.mrb[1].mxu1  ;;  %v2121_v18 = vpop.f32.mrb[0].mxu0 }
 0x1f2   : > { %v1619_v37 = vadd.f32 %v2928_v50, %v1618_v48  ;;  %v2130_v42 = vpop.f32.mrb[2].mxu1  ;;  %v1595_v2 = vadd.f32 %v2121_v18, %v2928_v50  ;;  %v1586_v35 = vpop.f32.mrb[1].mxu0 }
 0x1f3   : > { %v2083_v3 = vpack.c.bf16 %v1627_v16, %v1627_v16  ;;  %v1740_v63 = vmax.f32 %v1627_v16, 0.0  ;;  %v1630_v54 = vadd.f32 %v2130_v42, %v2928_v50  ;;  %v1621_v62 = vpop.f32.mrb[3].mxu1  ;;  %v1587_v27 = vadd.f32 %v2928_v50, %v1586_v35  ;;  %v2122_v29 = vpop.f32.mrb[2].mxu0 }
 0x1f4   : > { %v2081_v46 = vpack.c.bf16 %v1619_v37, %v1619_v37  ;;  %v1738_v11 = vmax.f32 %v1619_v37, 0.0  ;;  %v1622_v15 = vadd.f32 %v2928_v50, %v1621_v62  ;;  %v2075_v26 = vpack.c.bf16 %v1595_v2, %v1595_v2  ;;  %v1589_v53 = vpop.f32.mrb[3].mxu0 }
 0x1f5   : > { %v1732_v49 = vmax.f32 %v1595_v2, 0.0  ;;  %1724 = vst.msk [vmem:[%s2934_s30 + $0x28] sm:$0xf] %vm1713_vm9, %v2083_v3  ;;  %v2099_v39 = vpack.c.bf16 %v1740_v63, %v1740_v63  ;;  %v1598_v28 = vadd.f32 %v2122_v29, %v2928_v50  ;;  %v2073_v58 = vpack.c.bf16 %v1587_v27, %v1587_v27 }
 0x1f6   : > { %v1730_v1 = vmax.f32 %v1587_v27, 0.0  ;;  %1722 = vst.msk [vmem:[%s2934_s30 + $0x20] sm:$0xf] %vm1713_vm9, %v2081_v46  ;;  %v2097_v57 = vpack.c.bf16 %v1738_v11, %v1738_v11  ;;  %v2084_v17 = vpack.c.bf16 %v1630_v54, %v1630_v54  ;;  %1716 = vst.msk [vmem:[%s2934_s30 + $0x8] sm:$0xf] %vm1713_vm9, %v2075_v26  ;;  %v1741_v59 = vmax.f32 %v1630_v54, 0.0 }
 0x1f7   : > { %v2091_v13 = vpack.c.bf16 %v1732_v49, %v1732_v49  ;;  %1820 = vst.msk [vmem:[%s2942_s5 + $0x28] sm:$0xf] %vm1713_vm9, %v2099_v39  ;;  %v2076_v36 = vpack.c.bf16 %v1598_v28, %v1598_v28  ;;  %v1733_v22 = vmax.f32 %v1598_v28, 0.0  ;;  %1714 = vst.msk [vmem:[%s2934_s30] sm:$0xf] %vm1713_vm9, %v2073_v58  ;;  %v1590_v8 = vadd.f32 %v2928_v50, %v1589_v53 }
 0x1f8   : > { %v2089_v60 = vpack.c.bf16 %v1730_v1, %v1730_v1  ;;  %1818 = vst.msk [vmem:[%s2942_s5 + $0x20] sm:$0xf] %vm1713_vm9, %v2097_v57  ;;  %1725 = vst.msk [vmem:[%s2934_s30 + $0x2c] sm:$0xf] %vm1713_vm9, %v2084_v17  ;;  %v2082_v52 = vpack.c.bf16 %v1622_v15, %v1622_v15  ;;  %v1739_v0 = vmax.f32 %v1622_v15, 0.0  ;;  %v2100_v14 = vpack.c.bf16 %v1741_v59, %v1741_v59 }
 0x1f9   : > { %1812 = vst.msk [vmem:[%s2942_s5 + $0x8] sm:$0xf] %vm1713_vm9, %v2091_v13  ;;  %1717 = vst.msk [vmem:[%s2934_s30 + $0xc] sm:$0xf] %vm1713_vm9, %v2076_v36  ;;  %v2092_v23 = vpack.c.bf16 %v1733_v22, %v1733_v22  ;;  %v2074_v55 = vpack.c.bf16 %v1590_v8, %v1590_v8  ;;  %v1731_v61 = vmax.f32 %v1590_v8, 0.0 }
 0x1fa   : > { %1810 = vst.msk [vmem:[%s2942_s5] sm:$0xf] %vm1713_vm9, %v2089_v60  ;;  %1723 = vst.msk [vmem:[%s2934_s30 + $0x24] sm:$0xf] %vm1713_vm9, %v2082_v52  ;;  %v2098_v20 = vpack.c.bf16 %v1739_v0, %v1739_v0 }
 0x1fb   : > { %1813 = vst.msk [vmem:[%s2942_s5 + $0xc] sm:$0xf] %vm1713_vm9, %v2092_v23  ;;  %1821 = vst.msk [vmem:[%s2942_s5 + $0x2c] sm:$0xf] %vm1713_vm9, %v2100_v14  ;;  %v2090_v41 = vpack.c.bf16 %v1731_v61, %v1731_v61 }
 0x1fc   : > { %1715 = vst.msk [vmem:[%s2934_s30 + $0x4] sm:$0xf] %vm1713_vm9, %v2074_v55  ;;  %1819 = vst.msk [vmem:[%s2942_s5 + $0x24] sm:$0xf] %vm1713_vm9, %v2098_v20 }
 0x1fd   : > { %1811 = vst.msk [vmem:[%s2942_s5 + $0x4] sm:$0xf] %vm1713_vm9, %v2090_v41 }
 0x200   : > { %v2133_v25 = vpop.f32.mrb[4].mxu1 }
 0x201   : > { %v2125_v45 = vpop.f32.mrb[4].mxu0  ;;  %v1643_v47 = vadd.f32 %v2133_v25, %v2928_v50  ;;  %v1634_v30 = vpop.f32.mrb[5].mxu1 }
 0x202   : > { %v1611_v31 = vadd.f32 %v2125_v45, %v2928_v50  ;;  %v1602_v38 = vpop.f32.mrb[5].mxu0  ;;  %v1635_v33 = vadd.f32 %v2928_v50, %v1634_v30  ;;  %v2134_v19 = vpop.f32.mrb[6].mxu1 }
 0x203   : > { %v1603_v24 = vadd.f32 %v2928_v50, %v1602_v38  ;;  %v2126_v6 = vpop.f32.mrb[6].mxu0  ;;  %v2087_v21 = vpack.c.bf16 %v1643_v47, %v1643_v47  ;;  %v1744_v4 = vmax.f32 %v1643_v47, 0.0  ;;  %v1637_v7 = vpop.f32.mrb[7].mxu1  ;;  %v1646_v18 = vadd.f32 %v2134_v19, %v2928_v50 }
 0x204   : > { %v2079_v9 = vpack.c.bf16 %v1611_v31, %v1611_v31  ;;  %v1736_v43 = vmax.f32 %v1611_v31, 0.0  ;;  %v1614_v12 = vadd.f32 %v2126_v6, %v2928_v50  ;;  %v1605_v5 = vpop.f32.mrb[7].mxu0  ;;  %v2085_v51 = vpack.c.bf16 %v1635_v33, %v1635_v33 }
 0x205   : > { %v2077_v34 = vpack.c.bf16 %v1603_v24, %v1603_v24  ;;  %v1734_v32 = vmax.f32 %v1603_v24, 0.0  ;;  %v1742_v56 = vmax.f32 %v1635_v33, 0.0  ;;  %1728 = vst.msk [vmem:[%s2934_s30 + $0x38] sm:$0xf] %vm1713_vm9, %v2087_v21  ;;  %v2103_v44 = vpack.c.bf16 %v1744_v4, %v1744_v4 }
 0x206   : > { %1720 = vst.msk [vmem:[%s2934_s30 + $0x18] sm:$0xf] %vm1713_vm9, %v2079_v9  ;;  %v2095_v40 = vpack.c.bf16 %v1736_v43, %v1736_v43  ;;  %v2080_v10 = vpack.c.bf16 %v1614_v12, %v1614_v12  ;;  %v1737_v48 = vmax.f32 %v1614_v12, 0.0  ;;  %1726 = vst.msk [vmem:[%s2934_s30 + $0x30] sm:$0xf] %vm1713_vm9, %v2085_v51  ;;  %v1606_v42 = vadd.f32 %v2928_v50, %v1605_v5 }
 0x207   : > { %1718 = vst.msk [vmem:[%s2934_s30 + $0x10] sm:$0xf] %vm1713_vm9, %v2077_v34  ;;  %v2093_v16 = vpack.c.bf16 %v1734_v32, %v1734_v32  ;;  %v2101_v37 = vpack.c.bf16 %v1742_v56, %v1742_v56  ;;  %v1638_v2 = vadd.f32 %v2928_v50, %v1637_v7  ;;  %1824 = vst.msk [vmem:[%s2942_s5 + $0x38] sm:$0xf] %vm1713_vm9, %v2103_v44  ;;  %v1745_v35 = vmax.f32 %v1646_v18, 0.0 }
 0x208   : > { %1816 = vst.msk [vmem:[%s2942_s5 + $0x18] sm:$0xf] %vm1713_vm9, %v2095_v40  ;;  %1721 = vst.msk [vmem:[%s2934_s30 + $0x1c] sm:$0xf] %vm1713_vm9, %v2080_v10  ;;  %v2096_v3 = vpack.c.bf16 %v1737_v48, %v1737_v48  ;;  %v2088_v63 = vpack.c.bf16 %v1646_v18, %v1646_v18  ;;  %v2078_v54 = vpack.c.bf16 %v1606_v42, %v1606_v42  ;;  %v1735_v62 = vmax.f32 %v1606_v42, 0.0 }
 0x209   : > { %1814 = vst.msk [vmem:[%s2942_s5 + $0x10] sm:$0xf] %vm1713_vm9, %v2093_v16  ;;  %1822 = vst.msk [vmem:[%s2942_s5 + $0x30] sm:$0xf] %vm1713_vm9, %v2101_v37  ;;  %v2086_v27 = vpack.c.bf16 %v1638_v2, %v1638_v2  ;;  %v1743_v46 = vmax.f32 %v1638_v2, 0.0  ;;  %v2104_v50 = vpack.c.bf16 %v1745_v35, %v1745_v35 }
 0x20a   : > { %1817 = vst.msk [vmem:[%s2942_s5 + $0x1c] sm:$0xf] %vm1713_vm9, %v2096_v3  ;;  %1729 = vst.msk [vmem:[%s2934_s30 + $0x3c] sm:$0xf] %vm1713_vm9, %v2088_v63  ;;  %v2094_v11 = vpack.c.bf16 %v1735_v62, %v1735_v62 }
 0x20b   : > { %1719 = vst.msk [vmem:[%s2934_s30 + $0x14] sm:$0xf] %vm1713_vm9, %v2078_v54  ;;  %1727 = vst.msk [vmem:[%s2934_s30 + $0x34] sm:$0xf] %vm1713_vm9, %v2086_v27  ;;  %v2102_v29 = vpack.c.bf16 %v1743_v46, %v1743_v46 }
 0x20c   : > { %1825 = vst.msk [vmem:[%s2942_s5 + $0x3c] sm:$0xf] %vm1713_vm9, %v2104_v50  ;;  %1815 = vst.msk [vmem:[%s2942_s5 + $0x14] sm:$0xf] %vm1713_vm9, %v2094_v11 }
 0x20d   : > { %1823 = vst.msk [vmem:[%s2942_s5 + $0x34] sm:$0xf] %vm1713_vm9, %v2102_v29 }
 0x20e PF: > { %s15_s19 = sadd.s32 1, %s2233_s19   ;;  %s3074_s15 = smov %s2225_s17 }
 0x20f   : > { %p12_p11 = scmp.ge.s32.totalorder %s15_s19, 6   ;;  %s3075_s16 = smov %s2229_s18 }
 0x210   : > { %s3076_s17 = smov %s3079_s20  ;;  %s3077_s18 = smov %s3083_s21 }
 0x211   :  { %14 = sbr.rel (!%p12_p11) target bundleno = 3 (0x3), region = 77 }

</bundles_post_ra>
